<compile_context>
chip_gen: v7x
topology: tpu7x:2x2x1
jax: 0.10.0
libtpu: 0.0.40
codegen_flags: <defaults>
</compile_context>

<pallas_src>
import math
import functools

import jax
import jax.numpy as jnp
from jax.experimental import pallas as pl
from jax.experimental.pallas import tpu as pltpu


# ----------------------------------------------------------------------------
# Fused PerceiverBlock kernel (one batch element per grid step)
# ----------------------------------------------------------------------------

def _perceiver_block_kernel(
    # activations for this batch element
    lat_ref,            # (Q, D)  f32
    mem_ref,            # (S, D)  f32
    mask_ref,           # (1, S)  f32 additive key-padding mask
    # cross-attention weights (VMEM-resident, constant index_map)
    wq_ref, bq_ref,     # (D, D) bf16, (1, D) f32
    wkv_ref, bkv_ref,   # (D, 2D) bf16, (1, 2D) f32
    wco_ref, bco_ref,   # (D, D) bf16, (1, D) f32
    gc_ref, bc_ref,     # (1, D) f32 LayerNorm after cross-attn
    # stacked hidden-layer weights (leading dim = n_layers)
    wqkv_ref, bqkv_ref,  # (L, D, 3D) bf16, (L, 1, 3D) f32
    wso_ref, bso_ref,    # (L, D, D) bf16, (L, 1, D) f32
    g1_ref, be1_ref,     # (L, 1, D) f32
    w1_ref, b1_ref,      # (L, D, 4D) bf16, (L, 1, 4D) f32
    w2_ref, b2_ref,      # (L, 4D, D) bf16, (L, 1, D) f32
    g2_ref, be2_ref,     # (L, 1, D) f32
    # output
    out_ref,             # (Q, D) f32
    *, num_heads, num_heads_ca, n_layers, use_ln):
    f32 = jnp.float32
    bf16 = jnp.bfloat16

    def mm(a, w):
        # bf16 MXU matmul with f32 accumulation; `w` already bf16.
        return jnp.dot(a.astype(bf16), w, preferred_element_type=f32)

    def layer_norm(x, g, b):
        mu = jnp.mean(x, axis=-1, keepdims=True)
        var = jnp.mean(jnp.square(x - mu), axis=-1, keepdims=True)
        return (x - mu) * jax.lax.rsqrt(var + 1e-5) * g + b

    def attend(q, k, v, nheads, mask_add):
        # q: (Lq, D), k/v: (Lk, D); per-head static slices, lane-dense (Lq, D) output.
        d = q.shape[-1]
        dh = d // nheads
        scale = 1.0 / math.sqrt(dh)
        outs = []
        for h in range(nheads):
            lo, hi = h * dh, (h + 1) * dh
            qh = q[:, lo:hi].astype(bf16)
            kh = k[:, lo:hi].astype(bf16)
            vh = v[:, lo:hi].astype(bf16)
            s = jax.lax.dot_general(qh, kh, (((1,), (1,)), ((), ())),
                                    preferred_element_type=f32) * scale
            if mask_add is not None:
                s = s + mask_add
            s = s - jnp.max(s, axis=-1, keepdims=True)
            p = jnp.exp(s)
            inv = pl.reciprocal(jnp.sum(p, axis=-1, keepdims=True), approx=True)
            p = p * inv
            outs.append(jnp.dot(p.astype(bf16), vh, preferred_element_type=f32))
        return jnp.concatenate(outs, axis=-1)

    lat = lat_ref[...]
    mem = mem_ref[...]
    mask = mask_ref[...]
    D = lat.shape[-1]

    # ---- cross attention: latents attend memory (key padding mask on memory) ----
    q = mm(lat, wq_ref[...]) + bq_ref[...]
    kv = mm(mem, wkv_ref[...]) + bkv_ref[...]          # fused K,V projection
    k = kv[:, :D]
    v = kv[:, D:]
    a = attend(q, k, v, num_heads_ca, mask)
    x = lat + mm(a, wco_ref[...]) + bco_ref[...]
    if use_ln:
        x = layer_norm(x, gc_ref[...], bc_ref[...])

    # ---- hidden layers: self-attention (no mask) + GELU FFN, post-LN ----
    for i in range(n_layers):
        qkv = mm(x, wqkv_ref[i]) + bqkv_ref[i]          # fused Q,K,V projection
        qi = qkv[:, :D]
        ki = qkv[:, D:2 * D]
        vi = qkv[:, 2 * D:]
        a = attend(qi, ki, vi, num_heads, None)
        y = x + mm(a, wso_ref[i]) + bso_ref[i]
        if use_ln:
            y = layer_norm(y, g1_ref[i], be1_ref[i])
        h = mm(y, w1_ref[i]) + b1_ref[i]
        h = jax.nn.gelu(h)
        z = y + mm(h, w2_ref[i]) + b2_ref[i]
        if use_ln:
            z = layer_norm(z, g2_ref[i], be2_ref[i])
        x = z

    out_ref[...] = x


def _final_linear_kernel(x_ref, w_ref, b_ref, o_ref):
    o_ref[...] = (jnp.dot(x_ref[...].astype(jnp.bfloat16), w_ref[...],
                          preferred_element_type=jnp.float32) + b_ref[...])


# ----------------------------------------------------------------------------
# Wrappers
# ----------------------------------------------------------------------------

_BLOCK_WEIGHT_ORDER = (
    "wq", "bq", "wkv", "bkv", "wco", "bco", "g_cross", "b_cross",
    "wqkv", "bqkv", "wso", "bso", "g1", "be1", "w1", "b1", "w2", "b2", "g2", "be2",
)


def _const_spec(a):
    """BlockSpec for a weight that stays VMEM-resident across the whole grid."""
    if a.ndim == 2:
        return pl.BlockSpec(a.shape, lambda b: (0, 0))
    assert a.ndim == 3
    return pl.BlockSpec(a.shape, lambda b: (0, 0, 0))


def perceiver_block_fused(x, memory, mask_add, bp, *, num_heads, num_heads_ca, use_ln):
    """x: (B, Q, D), memory: (B, S, D), mask_add: (B, 1, S) additive f32."""
    B, Qn, D = x.shape
    S = memory.shape[1]
    weights = [bp[name] for name in _BLOCK_WEIGHT_ORDER]
    kernel = functools.partial(
        _perceiver_block_kernel,
        num_heads=num_heads, num_heads_ca=num_heads_ca,
        n_layers=bp["n_layers"], use_ln=use_ln)
    in_specs = [
        pl.BlockSpec((None, Qn, D), lambda b: (b, 0, 0)),   # latents
        pl.BlockSpec((None, S, D), lambda b: (b, 0, 0)),    # memory
        pl.BlockSpec((None, 1, S), lambda b: (b, 0, 0)),    # additive mask
    ] + [_const_spec(w) for w in weights]
    return pl.pallas_call(
        kernel,
        out_shape=jax.ShapeDtypeStruct((B, Qn, D), jnp.float32),
        grid=(B,),
        in_specs=in_specs,
        out_specs=pl.BlockSpec((None, Qn, D), lambda b: (b, 0, 0)),
        compiler_params=pltpu.CompilerParams(dimension_semantics=("parallel",)),
    )(x, memory, mask_add, *weights)


def final_linear(x, w_bf16, b):
    B, Qn, D = x.shape
    Do = w_bf16.shape[1]
    return pl.pallas_call(
        _final_linear_kernel,
        out_shape=jax.ShapeDtypeStruct((B, Qn, Do), jnp.float32),
        grid=(B,),
        in_specs=[pl.BlockSpec((None, Qn, D), lambda b: (b, 0, 0)),
                  pl.BlockSpec((D, Do), lambda b: (0, 0)),
                  pl.BlockSpec((1, Do), lambda b: (0, 0))],
        out_specs=pl.BlockSpec((None, Qn, Do), lambda b: (b, 0, 0)),
        compiler_params=pltpu.CompilerParams(dimension_semantics=("parallel",)),
    )(x, w_bf16, b)


def perceiver_decoder_apply(params, object_queries, memory, padding_mask,
                            num_heads=4, num_heads_cross_attention=4, ln=True):
    """object_queries: (Q, D); memory: (B, S, D); padding_mask: (B, S) bool (True = pad) or None."""
    B, S, _ = memory.shape
    # torch object_queries.repeat((B, 1, 1)) == broadcast to (B, Q, D)
    latents = jnp.broadcast_to(object_queries[None], (B,) + object_queries.shape)
    latents = latents.astype(jnp.float32)
    memory = memory.astype(jnp.float32)
    if padding_mask is None:
        mask_add = jnp.zeros((B, 1, S), jnp.float32)
    else:
        mask_add = jnp.where(padding_mask, jnp.float32(-1e9),
                             jnp.float32(0.0))[:, None, :]
    x = latents
    for bp in params["blocks"]:
        x = perceiver_block_fused(x, memory, mask_add, bp,
                                  num_heads=num_heads,
                                  num_heads_ca=num_heads_cross_attention,
                                  use_ln=ln)
    return final_linear(x, params["lin_w"], params["lin_b"])


# ----------------------------------------------------------------------------
# Deterministic parameter init (weights that feed the MXU are stored bf16)
# ----------------------------------------------------------------------------

def _dense(key, din, dout, scale=0.02):
    w = scale * jax.random.normal(key, (din, dout), jnp.float32)
    b = jnp.zeros((1, dout), jnp.float32)
    return w, b


def _init_block(key, d, n_hidden_layers):
    # n_hidden_layers is assumed >= 1 (matches the demo / typical configs).
    ks = jax.random.split(key, 1 + n_hidden_layers)
    ck = jax.random.split(ks[0], 4)
    wq, bq = _dense(ck[0], d, d)
    wk, bk = _dense(ck[1], d, d)
    wv, bv = _dense(ck[2], d, d)
    wo, bo = _dense(ck[3], d, d)

    hidden = 4 * d
    layers = []
    for i in range(n_hidden_layers):
        sk = jax.random.split(ks[1 + i], 6)
        wq_s, bq_s = _dense(sk[0], d, d)
        wk_s, bk_s = _dense(sk[1], d, d)
        wv_s, bv_s = _dense(sk[2], d, d)
        wo_s, bo_s = _dense(sk[3], d, d)
        w1, b1 = _dense(sk[4], d, hidden)
        w2, b2 = _dense(sk[5], hidden, d)
        layers.append(dict(
            wqkv=jnp.concatenate([wq_s, wk_s, wv_s], axis=1),
            bqkv=jnp.concatenate([bq_s, bk_s, bv_s], axis=1),
            wso=wo_s, bso=bo_s,
            g1=jnp.ones((1, d), jnp.float32), be1=jnp.zeros((1, d), jnp.float32),
            w1=w1, b1=b1, w2=w2, b2=b2,
            g2=jnp.ones((1, d), jnp.float32), be2=jnp.zeros((1, d), jnp.float32),
        ))

    def stack(name, dtype=jnp.float32):
        return jnp.stack([l[name] for l in layers]).astype(dtype)

    bf16 = jnp.bfloat16
    return dict(
        wq=wq.astype(bf16), bq=bq,
        wkv=jnp.concatenate([wk, wv], axis=1).astype(bf16),
        bkv=jnp.concatenate([bk, bv], axis=1),
        wco=wo.astype(bf16), bco=bo,
        g_cross=jnp.ones((1, d), jnp.float32), b_cross=jnp.zeros((1, d), jnp.float32),
        wqkv=stack("wqkv", bf16), bqkv=stack("bqkv"),
        wso=stack("wso", bf16), bso=stack("bso"),
        g1=stack("g1"), be1=stack("be1"),
        w1=stack("w1", bf16), b1=stack("b1"),
        w2=stack("w2", bf16), b2=stack("b2"),
        g2=stack("g2"), be2=stack("be2"),
        n_layers=n_hidden_layers,
    )


def init_perceiver_decoder(key, dim_latent, dim_output, n_perciver_blocks, n_hidden_layers):
    ks = jax.random.split(key, n_perciver_blocks + 1)
    params = {"blocks": [_init_block(ks[i], dim_latent, n_hidden_layers)
                         for i in range(n_perciver_blocks)]}
    lw, lb = _dense(ks[-1], dim_latent, dim_output)
    params["lin_w"] = lw.astype(jnp.bfloat16)
    params["lin_b"] = lb
    return params


# ----------------------------------------------------------------------------
# Demo
# ----------------------------------------------------------------------------

if __name__ == "__main__":
    dim_latent = 32
    dim_output = 16
    n_perciver_blocks = 2
    n_hidden_layers = 1
    num_heads = 4
    num_heads_cross_attention = 4

    B, Q, S = 2, 8, 16

    root = jax.random.PRNGKey(0)
    k_params, k_q, k_m = jax.random.split(root, 3)

    params = init_perceiver_decoder(k_params, dim_latent, dim_output,
                                    n_perciver_blocks, n_hidden_layers)

    object_queries = jax.random.normal(k_q, (Q, dim_latent), jnp.float32)
    memory = jax.random.normal(k_m, (B, S, dim_latent), jnp.float32)
    # True = padded position (ignored as key), matching torch key_padding_mask semantics.
    padding_mask = jnp.arange(S)[None, :] >= jnp.array([S, S - 4])[:, None]

    out = perceiver_decoder_apply(params, object_queries, memory, padding_mask,
                                  num_heads=num_heads,
                                  num_heads_cross_attention=num_heads_cross_attention,
                                  ln=True)
    out = jax.block_until_ready(out)
    assert out.shape == (B, Q, dim_output), out.shape
    assert bool(jnp.all(jnp.isfinite(out)))
    print("KERNEL_OK")
</pallas_src>

<mosaic_0001>
module attributes {stable_mosaic.version = 11 : i64} {
  func.func @_perceiver_block_kernel(%arg0: i32, %arg1: memref<1x8x32xf32, #tpu.memory_space<vmem>>, %arg2: memref<1x16x32xf32, #tpu.memory_space<vmem>>, %arg3: memref<1x1x16xf32, #tpu.memory_space<vmem>>, %arg4: memref<32x32xbf16, #tpu.memory_space<vmem>>, %arg5: memref<1x32xf32, #tpu.memory_space<vmem>>, %arg6: memref<32x64xbf16, #tpu.memory_space<vmem>>, %arg7: memref<1x64xf32, #tpu.memory_space<vmem>>, %arg8: memref<32x32xbf16, #tpu.memory_space<vmem>>, %arg9: memref<1x32xf32, #tpu.memory_space<vmem>>, %arg10: memref<1x32xf32, #tpu.memory_space<vmem>>, %arg11: memref<1x32xf32, #tpu.memory_space<vmem>>, %arg12: memref<1x32x96xbf16, #tpu.memory_space<vmem>>, %arg13: memref<1x1x96xf32, #tpu.memory_space<vmem>>, %arg14: memref<1x32x32xbf16, #tpu.memory_space<vmem>>, %arg15: memref<1x1x32xf32, #tpu.memory_space<vmem>>, %arg16: memref<1x1x32xf32, #tpu.memory_space<vmem>>, %arg17: memref<1x1x32xf32, #tpu.memory_space<vmem>>, %arg18: memref<1x32x128xbf16, #tpu.memory_space<vmem>>, %arg19: memref<1x1x128xf32, #tpu.memory_space<vmem>>, %arg20: memref<1x128x32xbf16, #tpu.memory_space<vmem>>, %arg21: memref<1x1x32xf32, #tpu.memory_space<vmem>>, %arg22: memref<1x1x32xf32, #tpu.memory_space<vmem>>, %arg23: memref<1x1x32xf32, #tpu.memory_space<vmem>>, %arg24: memref<1x8x32xf32, #tpu.memory_space<vmem>>) attributes {dimension_semantics = [#tpu.dimension_semantics<parallel>], iteration_bounds = array<i64: 2>, scalar_prefetch = 0 : i64, scratch_operands = 0 : i64, tpu.core_type = #tpu.core_type<tc>, window_params = [{transform_indices = @transform_0, window_bounds = array<i64: 1, 8, 32>}, {transform_indices = @transform_1, window_bounds = array<i64: 1, 16, 32>}, {transform_indices = @transform_2, window_bounds = array<i64: 1, 1, 16>}, {pipeline_mode = #tpu.pipeline_mode<synchronous>, transform_indices = @transform_3, window_bounds = array<i64: 32, 32>}, {pipeline_mode = #tpu.pipeline_mode<synchronous>, transform_indices = @transform_4, window_bounds = array<i64: 1, 32>}, {pipeline_mode = #tpu.pipeline_mode<synchronous>, transform_indices = @transform_5, window_bounds = array<i64: 32, 64>}, {pipeline_mode = #tpu.pipeline_mode<synchronous>, transform_indices = @transform_6, window_bounds = array<i64: 1, 64>}, {pipeline_mode = #tpu.pipeline_mode<synchronous>, transform_indices = @transform_7, window_bounds = array<i64: 32, 32>}, {pipeline_mode = #tpu.pipeline_mode<synchronous>, transform_indices = @transform_8, window_bounds = array<i64: 1, 32>}, {pipeline_mode = #tpu.pipeline_mode<synchronous>, transform_indices = @transform_9, window_bounds = array<i64: 1, 32>}, {pipeline_mode = #tpu.pipeline_mode<synchronous>, transform_indices = @transform_10, window_bounds = array<i64: 1, 32>}, {pipeline_mode = #tpu.pipeline_mode<synchronous>, transform_indices = @transform_11, window_bounds = array<i64: 1, 32, 96>}, {pipeline_mode = #tpu.pipeline_mode<synchronous>, transform_indices = @transform_12, window_bounds = array<i64: 1, 1, 96>}, {pipeline_mode = #tpu.pipeline_mode<synchronous>, transform_indices = @transform_13, window_bounds = array<i64: 1, 32, 32>}, {pipeline_mode = #tpu.pipeline_mode<synchronous>, transform_indices = @transform_14, window_bounds = array<i64: 1, 1, 32>}, {pipeline_mode = #tpu.pipeline_mode<synchronous>, transform_indices = @transform_15, window_bounds = array<i64: 1, 1, 32>}, {pipeline_mode = #tpu.pipeline_mode<synchronous>, transform_indices = @transform_16, window_bounds = array<i64: 1, 1, 32>}, {pipeline_mode = #tpu.pipeline_mode<synchronous>, transform_indices = @transform_17, window_bounds = array<i64: 1, 32, 128>}, {pipeline_mode = #tpu.pipeline_mode<synchronous>, transform_indices = @transform_18, window_bounds = array<i64: 1, 1, 128>}, {pipeline_mode = #tpu.pipeline_mode<synchronous>, transform_indices = @transform_19, window_bounds = array<i64: 1, 128, 32>}, {pipeline_mode = #tpu.pipeline_mode<synchronous>, transform_indices = @transform_20, window_bounds = array<i64: 1, 1, 32>}, {pipeline_mode = #tpu.pipeline_mode<synchronous>, transform_indices = @transform_21, window_bounds = array<i64: 1, 1, 32>}, {pipeline_mode = #tpu.pipeline_mode<synchronous>, transform_indices = @transform_22, window_bounds = array<i64: 1, 1, 32>}, {transform_indices = @transform_23, window_bounds = array<i64: 1, 8, 32>}]} {
    %c0 = arith.constant 0 : index
    %c0_0 = arith.constant 0 : index
    %c0_1 = arith.constant 0 : index
    %0 = vector.load %arg1[%c0, %c0_0, %c0_1] : memref<1x8x32xf32, #tpu.memory_space<vmem>>, vector<1x8x32xf32>
    %1 = vector.shape_cast %0 : vector<1x8x32xf32> to vector<8x32xf32>
    %c0_2 = arith.constant 0 : index
    %c0_3 = arith.constant 0 : index
    %c0_4 = arith.constant 0 : index
    %2 = vector.load %arg2[%c0_2, %c0_3, %c0_4] : memref<1x16x32xf32, #tpu.memory_space<vmem>>, vector<1x16x32xf32>
    %3 = vector.shape_cast %2 : vector<1x16x32xf32> to vector<16x32xf32>
    %c0_5 = arith.constant 0 : index
    %c0_6 = arith.constant 0 : index
    %c0_7 = arith.constant 0 : index
    %4 = vector.load %arg3[%c0_5, %c0_6, %c0_7] : memref<1x1x16xf32, #tpu.memory_space<vmem>>, vector<1x1x16xf32>
    %5 = vector.shape_cast %4 : vector<1x1x16xf32> to vector<1x16xf32>
    %c0_8 = arith.constant 0 : index
    %c0_9 = arith.constant 0 : index
    %6 = vector.load %arg4[%c0_8, %c0_9] : memref<32x32xbf16, #tpu.memory_space<vmem>>, vector<32x32xbf16>
    %7 = arith.truncf %1 : vector<8x32xf32> to vector<8x32xbf16>
    %cst = arith.constant dense<0.000000e+00> : vector<8x32xf32>
    %8 = tpu.matmul %7, %6, %cst {dimension_numbers = #tpu.dot_dimension_numbers<[1], [0], [0], [1], [0, 0, 1, 1], [], []>} : vector<8x32xbf16>, vector<32x32xbf16>, vector<8x32xf32> -> vector<8x32xf32>
    %c0_10 = arith.constant 0 : index
    %c0_11 = arith.constant 0 : index
    %9 = vector.load %arg5[%c0_10, %c0_11] : memref<1x32xf32, #tpu.memory_space<vmem>>, vector<1x32xf32>
    %10 = vector.broadcast %9 : vector<1x32xf32> to vector<8x32xf32>
    %11 = arith.addf %8, %10 : vector<8x32xf32>
    %c0_12 = arith.constant 0 : index
    %c0_13 = arith.constant 0 : index
    %12 = vector.load %arg6[%c0_12, %c0_13] : memref<32x64xbf16, #tpu.memory_space<vmem>>, vector<32x64xbf16>
    %13 = arith.truncf %3 : vector<16x32xf32> to vector<16x32xbf16>
    %cst_14 = arith.constant dense<0.000000e+00> : vector<16x64xf32>
    %14 = tpu.matmul %13, %12, %cst_14 {dimension_numbers = #tpu.dot_dimension_numbers<[1], [0], [0], [1], [0, 0, 1, 1], [], []>} : vector<16x32xbf16>, vector<32x64xbf16>, vector<16x64xf32> -> vector<16x64xf32>
    %c0_15 = arith.constant 0 : index
    %c0_16 = arith.constant 0 : index
    %15 = vector.load %arg7[%c0_15, %c0_16] : memref<1x64xf32, #tpu.memory_space<vmem>>, vector<1x64xf32>
    %16 = vector.broadcast %15 : vector<1x64xf32> to vector<16x64xf32>
    %17 = arith.addf %14, %16 : vector<16x64xf32>
    %18 = vector.extract_strided_slice %17 {offsets = [0, 0], sizes = [16, 32], strides = [1, 1]} : vector<16x64xf32> to vector<16x32xf32>
    %19 = vector.extract_strided_slice %17 {offsets = [0, 32], sizes = [16, 32], strides = [1, 1]} : vector<16x64xf32> to vector<16x32xf32>
    %20 = vector.extract_strided_slice %11 {offsets = [0, 0], sizes = [8, 8], strides = [1, 1]} : vector<8x32xf32> to vector<8x8xf32>
    %21 = arith.truncf %20 : vector<8x8xf32> to vector<8x8xbf16>
    %22 = vector.extract_strided_slice %18 {offsets = [0, 0], sizes = [16, 8], strides = [1, 1]} : vector<16x32xf32> to vector<16x8xf32>
    %23 = arith.truncf %22 : vector<16x8xf32> to vector<16x8xbf16>
    %24 = vector.extract_strided_slice %19 {offsets = [0, 0], sizes = [16, 8], strides = [1, 1]} : vector<16x32xf32> to vector<16x8xf32>
    %25 = arith.truncf %24 : vector<16x8xf32> to vector<16x8xbf16>
    %cst_17 = arith.constant dense<0.000000e+00> : vector<8x16xf32>
    %26 = tpu.matmul %21, %23, %cst_17 {dimension_numbers = #tpu.dot_dimension_numbers<[1], [1], [0], [0], [0, 0, 1, 0], [], []>} : vector<8x8xbf16>, vector<16x8xbf16>, vector<8x16xf32> -> vector<8x16xf32>
    %cst_18 = arith.constant 0.353553385 : f32
    %27 = vector.broadcast %cst_18 : f32 to vector<8x16xf32>
    %28 = arith.mulf %26, %27 : vector<8x16xf32>
    %29 = vector.broadcast %5 : vector<1x16xf32> to vector<8x16xf32>
    %30 = arith.addf %28, %29 : vector<8x16xf32>
    %cst_19 = arith.constant dense<0xFF800000> : vector<8xf32>
    %31 = vector.multi_reduction <maximumf>, %30, %cst_19 [1] : vector<8x16xf32> to vector<8xf32>
    %32 = vector.shape_cast %31 : vector<8xf32> to vector<8x1xf32>
    %33 = vector.broadcast %32 : vector<8x1xf32> to vector<8x16xf32>
    %34 = arith.subf %30, %33 : vector<8x16xf32>
    %35 = math.exp %34 : vector<8x16xf32>
    %cst_20 = arith.constant dense<0.000000e+00> : vector<8xf32>
    %36 = vector.multi_reduction <add>, %35, %cst_20 [1] : vector<8x16xf32> to vector<8xf32>
    %37 = vector.shape_cast %36 : vector<8xf32> to vector<8x1xf32>
    %38 = tpu.reciprocal %37 {approx = true} : vector<8x1xf32> -> vector<8x1xf32>
    %39 = vector.broadcast %38 : vector<8x1xf32> to vector<8x16xf32>
    %40 = arith.mulf %35, %39 : vector<8x16xf32>
    %41 = arith.truncf %40 : vector<8x16xf32> to vector<8x16xbf16>
    %cst_21 = arith.constant dense<0.000000e+00> : vector<8x8xf32>
    %42 = tpu.matmul %41, %25, %cst_21 {dimension_numbers = #tpu.dot_dimension_numbers<[1], [0], [0], [1], [0, 0, 1, 1], [], []>} : vector<8x16xbf16>, vector<16x8xbf16>, vector<8x8xf32> -> vector<8x8xf32>
    %43 = vector.extract_strided_slice %11 {offsets = [0, 8], sizes = [8, 8], strides = [1, 1]} : vector<8x32xf32> to vector<8x8xf32>
    %44 = arith.truncf %43 : vector<8x8xf32> to vector<8x8xbf16>
    %45 = vector.extract_strided_slice %18 {offsets = [0, 8], sizes = [16, 8], strides = [1, 1]} : vector<16x32xf32> to vector<16x8xf32>
    %46 = arith.truncf %45 : vector<16x8xf32> to vector<16x8xbf16>
    %47 = vector.extract_strided_slice %19 {offsets = [0, 8], sizes = [16, 8], strides = [1, 1]} : vector<16x32xf32> to vector<16x8xf32>
    %48 = arith.truncf %47 : vector<16x8xf32> to vector<16x8xbf16>
    %cst_22 = arith.constant dense<0.000000e+00> : vector<8x16xf32>
    %49 = tpu.matmul %44, %46, %cst_22 {dimension_numbers = #tpu.dot_dimension_numbers<[1], [1], [0], [0], [0, 0, 1, 0], [], []>} : vector<8x8xbf16>, vector<16x8xbf16>, vector<8x16xf32> -> vector<8x16xf32>
    %cst_23 = arith.constant 0.353553385 : f32
    %50 = vector.broadcast %cst_23 : f32 to vector<8x16xf32>
    %51 = arith.mulf %49, %50 : vector<8x16xf32>
    %52 = vector.broadcast %5 : vector<1x16xf32> to vector<8x16xf32>
    %53 = arith.addf %51, %52 : vector<8x16xf32>
    %cst_24 = arith.constant dense<0xFF800000> : vector<8xf32>
    %54 = vector.multi_reduction <maximumf>, %53, %cst_24 [1] : vector<8x16xf32> to vector<8xf32>
    %55 = vector.shape_cast %54 : vector<8xf32> to vector<8x1xf32>
    %56 = vector.broadcast %55 : vector<8x1xf32> to vector<8x16xf32>
    %57 = arith.subf %53, %56 : vector<8x16xf32>
    %58 = math.exp %57 : vector<8x16xf32>
    %cst_25 = arith.constant dense<0.000000e+00> : vector<8xf32>
    %59 = vector.multi_reduction <add>, %58, %cst_25 [1] : vector<8x16xf32> to vector<8xf32>
    %60 = vector.shape_cast %59 : vector<8xf32> to vector<8x1xf32>
    %61 = tpu.reciprocal %60 {approx = true} : vector<8x1xf32> -> vector<8x1xf32>
    %62 = vector.broadcast %61 : vector<8x1xf32> to vector<8x16xf32>
    %63 = arith.mulf %58, %62 : vector<8x16xf32>
    %64 = arith.truncf %63 : vector<8x16xf32> to vector<8x16xbf16>
    %cst_26 = arith.constant dense<0.000000e+00> : vector<8x8xf32>
    %65 = tpu.matmul %64, %48, %cst_26 {dimension_numbers = #tpu.dot_dimension_numbers<[1], [0], [0], [1], [0, 0, 1, 1], [], []>} : vector<8x16xbf16>, vector<16x8xbf16>, vector<8x8xf32> -> vector<8x8xf32>
    %66 = vector.extract_strided_slice %11 {offsets = [0, 16], sizes = [8, 8], strides = [1, 1]} : vector<8x32xf32> to vector<8x8xf32>
    %67 = arith.truncf %66 : vector<8x8xf32> to vector<8x8xbf16>
    %68 = vector.extract_strided_slice %18 {offsets = [0, 16], sizes = [16, 8], strides = [1, 1]} : vector<16x32xf32> to vector<16x8xf32>
    %69 = arith.truncf %68 : vector<16x8xf32> to vector<16x8xbf16>
    %70 = vector.extract_strided_slice %19 {offsets = [0, 16], sizes = [16, 8], strides = [1, 1]} : vector<16x32xf32> to vector<16x8xf32>
    %71 = arith.truncf %70 : vector<16x8xf32> to vector<16x8xbf16>
    %cst_27 = arith.constant dense<0.000000e+00> : vector<8x16xf32>
    %72 = tpu.matmul %67, %69, %cst_27 {dimension_numbers = #tpu.dot_dimension_numbers<[1], [1], [0], [0], [0, 0, 1, 0], [], []>} : vector<8x8xbf16>, vector<16x8xbf16>, vector<8x16xf32> -> vector<8x16xf32>
    %cst_28 = arith.constant 0.353553385 : f32
    %73 = vector.broadcast %cst_28 : f32 to vector<8x16xf32>
    %74 = arith.mulf %72, %73 : vector<8x16xf32>
    %75 = vector.broadcast %5 : vector<1x16xf32> to vector<8x16xf32>
    %76 = arith.addf %74, %75 : vector<8x16xf32>
    %cst_29 = arith.constant dense<0xFF800000> : vector<8xf32>
    %77 = vector.multi_reduction <maximumf>, %76, %cst_29 [1] : vector<8x16xf32> to vector<8xf32>
    %78 = vector.shape_cast %77 : vector<8xf32> to vector<8x1xf32>
    %79 = vector.broadcast %78 : vector<8x1xf32> to vector<8x16xf32>
    %80 = arith.subf %76, %79 : vector<8x16xf32>
    %81 = math.exp %80 : vector<8x16xf32>
    %cst_30 = arith.constant dense<0.000000e+00> : vector<8xf32>
    %82 = vector.multi_reduction <add>, %81, %cst_30 [1] : vector<8x16xf32> to vector<8xf32>
    %83 = vector.shape_cast %82 : vector<8xf32> to vector<8x1xf32>
    %84 = tpu.reciprocal %83 {approx = true} : vector<8x1xf32> -> vector<8x1xf32>
    %85 = vector.broadcast %84 : vector<8x1xf32> to vector<8x16xf32>
    %86 = arith.mulf %81, %85 : vector<8x16xf32>
    %87 = arith.truncf %86 : vector<8x16xf32> to vector<8x16xbf16>
    %cst_31 = arith.constant dense<0.000000e+00> : vector<8x8xf32>
    %88 = tpu.matmul %87, %71, %cst_31 {dimension_numbers = #tpu.dot_dimension_numbers<[1], [0], [0], [1], [0, 0, 1, 1], [], []>} : vector<8x16xbf16>, vector<16x8xbf16>, vector<8x8xf32> -> vector<8x8xf32>
    %89 = vector.extract_strided_slice %11 {offsets = [0, 24], sizes = [8, 8], strides = [1, 1]} : vector<8x32xf32> to vector<8x8xf32>
    %90 = arith.truncf %89 : vector<8x8xf32> to vector<8x8xbf16>
    %91 = vector.extract_strided_slice %18 {offsets = [0, 24], sizes = [16, 8], strides = [1, 1]} : vector<16x32xf32> to vector<16x8xf32>
    %92 = arith.truncf %91 : vector<16x8xf32> to vector<16x8xbf16>
    %93 = vector.extract_strided_slice %19 {offsets = [0, 24], sizes = [16, 8], strides = [1, 1]} : vector<16x32xf32> to vector<16x8xf32>
    %94 = arith.truncf %93 : vector<16x8xf32> to vector<16x8xbf16>
    %cst_32 = arith.constant dense<0.000000e+00> : vector<8x16xf32>
    %95 = tpu.matmul %90, %92, %cst_32 {dimension_numbers = #tpu.dot_dimension_numbers<[1], [1], [0], [0], [0, 0, 1, 0], [], []>} : vector<8x8xbf16>, vector<16x8xbf16>, vector<8x16xf32> -> vector<8x16xf32>
    %cst_33 = arith.constant 0.353553385 : f32
    %96 = vector.broadcast %cst_33 : f32 to vector<8x16xf32>
    %97 = arith.mulf %95, %96 : vector<8x16xf32>
    %98 = vector.broadcast %5 : vector<1x16xf32> to vector<8x16xf32>
    %99 = arith.addf %97, %98 : vector<8x16xf32>
    %cst_34 = arith.constant dense<0xFF800000> : vector<8xf32>
    %100 = vector.multi_reduction <maximumf>, %99, %cst_34 [1] : vector<8x16xf32> to vector<8xf32>
    %101 = vector.shape_cast %100 : vector<8xf32> to vector<8x1xf32>
    %102 = vector.broadcast %101 : vector<8x1xf32> to vector<8x16xf32>
    %103 = arith.subf %99, %102 : vector<8x16xf32>
    %104 = math.exp %103 : vector<8x16xf32>
    %cst_35 = arith.constant dense<0.000000e+00> : vector<8xf32>
    %105 = vector.multi_reduction <add>, %104, %cst_35 [1] : vector<8x16xf32> to vector<8xf32>
    %106 = vector.shape_cast %105 : vector<8xf32> to vector<8x1xf32>
    %107 = tpu.reciprocal %106 {approx = true} : vector<8x1xf32> -> vector<8x1xf32>
    %108 = vector.broadcast %107 : vector<8x1xf32> to vector<8x16xf32>
    %109 = arith.mulf %104, %108 : vector<8x16xf32>
    %110 = arith.truncf %109 : vector<8x16xf32> to vector<8x16xbf16>
    %cst_36 = arith.constant dense<0.000000e+00> : vector<8x8xf32>
    %111 = tpu.matmul %110, %94, %cst_36 {dimension_numbers = #tpu.dot_dimension_numbers<[1], [0], [0], [1], [0, 0, 1, 1], [], []>} : vector<8x16xbf16>, vector<16x8xbf16>, vector<8x8xf32> -> vector<8x8xf32>
    %112 = tpu.concatenate %42, %65, %88, %111 in 1 : vector<8x8xf32>, vector<8x8xf32>, vector<8x8xf32>, vector<8x8xf32> -> vector<8x32xf32>
    %c0_37 = arith.constant 0 : index
    %c0_38 = arith.constant 0 : index
    %113 = vector.load %arg8[%c0_37, %c0_38] : memref<32x32xbf16, #tpu.memory_space<vmem>>, vector<32x32xbf16>
    %114 = arith.truncf %112 : vector<8x32xf32> to vector<8x32xbf16>
    %cst_39 = arith.constant dense<0.000000e+00> : vector<8x32xf32>
    %115 = tpu.matmul %114, %113, %cst_39 {dimension_numbers = #tpu.dot_dimension_numbers<[1], [0], [0], [1], [0, 0, 1, 1], [], []>} : vector<8x32xbf16>, vector<32x32xbf16>, vector<8x32xf32> -> vector<8x32xf32>
    %116 = arith.addf %1, %115 : vector<8x32xf32>
    %c0_40 = arith.constant 0 : index
    %c0_41 = arith.constant 0 : index
    %117 = vector.load %arg9[%c0_40, %c0_41] : memref<1x32xf32, #tpu.memory_space<vmem>>, vector<1x32xf32>
    %118 = vector.broadcast %117 : vector<1x32xf32> to vector<8x32xf32>
    %119 = arith.addf %116, %118 : vector<8x32xf32>
    %c0_42 = arith.constant 0 : index
    %c0_43 = arith.constant 0 : index
    %120 = vector.load %arg10[%c0_42, %c0_43] : memref<1x32xf32, #tpu.memory_space<vmem>>, vector<1x32xf32>
    %c0_44 = arith.constant 0 : index
    %c0_45 = arith.constant 0 : index
    %121 = vector.load %arg11[%c0_44, %c0_45] : memref<1x32xf32, #tpu.memory_space<vmem>>, vector<1x32xf32>
    %cst_46 = arith.constant dense<0.000000e+00> : vector<8xf32>
    %122 = vector.multi_reduction <add>, %119, %cst_46 [1] : vector<8x32xf32> to vector<8xf32>
    %123 = vector.shape_cast %122 : vector<8xf32> to vector<8x1xf32>
    %cst_47 = arith.constant 3.200000e+01 : f32
    %124 = vector.broadcast %cst_47 : f32 to vector<8x1xf32>
    %125 = arith.divf %123, %124 : vector<8x1xf32>
    %126 = vector.broadcast %125 : vector<8x1xf32> to vector<8x32xf32>
    %127 = arith.subf %119, %126 : vector<8x32xf32>
    %128 = arith.mulf %127, %127 : vector<8x32xf32>
    %cst_48 = arith.constant dense<0.000000e+00> : vector<8xf32>
    %129 = vector.multi_reduction <add>, %128, %cst_48 [1] : vector<8x32xf32> to vector<8xf32>
    %130 = vector.shape_cast %129 : vector<8xf32> to vector<8x1xf32>
    %cst_49 = arith.constant 3.200000e+01 : f32
    %131 = vector.broadcast %cst_49 : f32 to vector<8x1xf32>
    %132 = arith.divf %130, %131 : vector<8x1xf32>
    %133 = vector.broadcast %125 : vector<8x1xf32> to vector<8x32xf32>
    %134 = arith.subf %119, %133 : vector<8x32xf32>
    %cst_50 = arith.constant 9.99999974E-6 : f32
    %135 = vector.broadcast %cst_50 : f32 to vector<8x1xf32>
    %136 = arith.addf %132, %135 : vector<8x1xf32>
    %137 = math.rsqrt %136 : vector<8x1xf32>
    %138 = vector.broadcast %137 : vector<8x1xf32> to vector<8x32xf32>
    %139 = arith.mulf %134, %138 : vector<8x32xf32>
    %140 = vector.broadcast %120 : vector<1x32xf32> to vector<8x32xf32>
    %141 = arith.mulf %139, %140 : vector<8x32xf32>
    %142 = vector.broadcast %121 : vector<1x32xf32> to vector<8x32xf32>
    %143 = arith.addf %141, %142 : vector<8x32xf32>
    %c0_51 = arith.constant 0 : index
    %c0_52 = arith.constant 0 : index
    %c0_53 = arith.constant 0 : index
    %144 = vector.load %arg12[%c0_51, %c0_52, %c0_53] : memref<1x32x96xbf16, #tpu.memory_space<vmem>>, vector<1x32x96xbf16>
    %145 = vector.shape_cast %144 : vector<1x32x96xbf16> to vector<32x96xbf16>
    %146 = arith.truncf %143 : vector<8x32xf32> to vector<8x32xbf16>
    %cst_54 = arith.constant dense<0.000000e+00> : vector<8x96xf32>
    %147 = tpu.matmul %146, %145, %cst_54 {dimension_numbers = #tpu.dot_dimension_numbers<[1], [0], [0], [1], [0, 0, 1, 1], [], []>} : vector<8x32xbf16>, vector<32x96xbf16>, vector<8x96xf32> -> vector<8x96xf32>
    %c0_55 = arith.constant 0 : index
    %c0_56 = arith.constant 0 : index
    %c0_57 = arith.constant 0 : index
    %148 = vector.load %arg13[%c0_55, %c0_56, %c0_57] : memref<1x1x96xf32, #tpu.memory_space<vmem>>, vector<1x1x96xf32>
    %149 = vector.shape_cast %148 : vector<1x1x96xf32> to vector<1x96xf32>
    %150 = vector.broadcast %149 : vector<1x96xf32> to vector<8x96xf32>
    %151 = arith.addf %147, %150 : vector<8x96xf32>
    %152 = vector.extract_strided_slice %151 {offsets = [0, 0], sizes = [8, 32], strides = [1, 1]} : vector<8x96xf32> to vector<8x32xf32>
    %153 = vector.extract_strided_slice %151 {offsets = [0, 32], sizes = [8, 32], strides = [1, 1]} : vector<8x96xf32> to vector<8x32xf32>
    %154 = vector.extract_strided_slice %151 {offsets = [0, 64], sizes = [8, 32], strides = [1, 1]} : vector<8x96xf32> to vector<8x32xf32>
    %155 = vector.extract_strided_slice %152 {offsets = [0, 0], sizes = [8, 8], strides = [1, 1]} : vector<8x32xf32> to vector<8x8xf32>
    %156 = arith.truncf %155 : vector<8x8xf32> to vector<8x8xbf16>
    %157 = vector.extract_strided_slice %153 {offsets = [0, 0], sizes = [8, 8], strides = [1, 1]} : vector<8x32xf32> to vector<8x8xf32>
    %158 = arith.truncf %157 : vector<8x8xf32> to vector<8x8xbf16>
    %159 = vector.extract_strided_slice %154 {offsets = [0, 0], sizes = [8, 8], strides = [1, 1]} : vector<8x32xf32> to vector<8x8xf32>
    %160 = arith.truncf %159 : vector<8x8xf32> to vector<8x8xbf16>
    %cst_58 = arith.constant dense<0.000000e+00> : vector<8x8xf32>
    %161 = tpu.matmul %156, %158, %cst_58 {dimension_numbers = #tpu.dot_dimension_numbers<[1], [1], [0], [0], [0, 0, 1, 0], [], []>} : vector<8x8xbf16>, vector<8x8xbf16>, vector<8x8xf32> -> vector<8x8xf32>
    %cst_59 = arith.constant 0.353553385 : f32
    %162 = vector.broadcast %cst_59 : f32 to vector<8x8xf32>
    %163 = arith.mulf %161, %162 : vector<8x8xf32>
    %cst_60 = arith.constant dense<0xFF800000> : vector<8xf32>
    %164 = vector.multi_reduction <maximumf>, %163, %cst_60 [1] : vector<8x8xf32> to vector<8xf32>
    %165 = vector.shape_cast %164 : vector<8xf32> to vector<8x1xf32>
    %166 = vector.broadcast %165 : vector<8x1xf32> to vector<8x8xf32>
    %167 = arith.subf %163, %166 : vector<8x8xf32>
    %168 = math.exp %167 : vector<8x8xf32>
    %cst_61 = arith.constant dense<0.000000e+00> : vector<8xf32>
    %169 = vector.multi_reduction <add>, %168, %cst_61 [1] : vector<8x8xf32> to vector<8xf32>
    %170 = vector.shape_cast %169 : vector<8xf32> to vector<8x1xf32>
    %171 = tpu.reciprocal %170 {approx = true} : vector<8x1xf32> -> vector<8x1xf32>
    %172 = vector.broadcast %171 : vector<8x1xf32> to vector<8x8xf32>
    %173 = arith.mulf %168, %172 : vector<8x8xf32>
    %174 = arith.truncf %173 : vector<8x8xf32> to vector<8x8xbf16>
    %cst_62 = arith.constant dense<0.000000e+00> : vector<8x8xf32>
    %175 = tpu.matmul %174, %160, %cst_62 {dimension_numbers = #tpu.dot_dimension_numbers<[1], [0], [0], [1], [0, 0, 1, 1], [], []>} : vector<8x8xbf16>, vector<8x8xbf16>, vector<8x8xf32> -> vector<8x8xf32>
    %176 = vector.extract_strided_slice %152 {offsets = [0, 8], sizes = [8, 8], strides = [1, 1]} : vector<8x32xf32> to vector<8x8xf32>
    %177 = arith.truncf %176 : vector<8x8xf32> to vector<8x8xbf16>
    %178 = vector.extract_strided_slice %153 {offsets = [0, 8], sizes = [8, 8], strides = [1, 1]} : vector<8x32xf32> to vector<8x8xf32>
    %179 = arith.truncf %178 : vector<8x8xf32> to vector<8x8xbf16>
    %180 = vector.extract_strided_slice %154 {offsets = [0, 8], sizes = [8, 8], strides = [1, 1]} : vector<8x32xf32> to vector<8x8xf32>
    %181 = arith.truncf %180 : vector<8x8xf32> to vector<8x8xbf16>
    %cst_63 = arith.constant dense<0.000000e+00> : vector<8x8xf32>
    %182 = tpu.matmul %177, %179, %cst_63 {dimension_numbers = #tpu.dot_dimension_numbers<[1], [1], [0], [0], [0, 0, 1, 0], [], []>} : vector<8x8xbf16>, vector<8x8xbf16>, vector<8x8xf32> -> vector<8x8xf32>
    %cst_64 = arith.constant 0.353553385 : f32
    %183 = vector.broadcast %cst_64 : f32 to vector<8x8xf32>
    %184 = arith.mulf %182, %183 : vector<8x8xf32>
    %cst_65 = arith.constant dense<0xFF800000> : vector<8xf32>
    %185 = vector.multi_reduction <maximumf>, %184, %cst_65 [1] : vector<8x8xf32> to vector<8xf32>
    %186 = vector.shape_cast %185 : vector<8xf32> to vector<8x1xf32>
    %187 = vector.broadcast %186 : vector<8x1xf32> to vector<8x8xf32>
    %188 = arith.subf %184, %187 : vector<8x8xf32>
    %189 = math.exp %188 : vector<8x8xf32>
    %cst_66 = arith.constant dense<0.000000e+00> : vector<8xf32>
    %190 = vector.multi_reduction <add>, %189, %cst_66 [1] : vector<8x8xf32> to vector<8xf32>
    %191 = vector.shape_cast %190 : vector<8xf32> to vector<8x1xf32>
    %192 = tpu.reciprocal %191 {approx = true} : vector<8x1xf32> -> vector<8x1xf32>
    %193 = vector.broadcast %192 : vector<8x1xf32> to vector<8x8xf32>
    %194 = arith.mulf %189, %193 : vector<8x8xf32>
    %195 = arith.truncf %194 : vector<8x8xf32> to vector<8x8xbf16>
    %cst_67 = arith.constant dense<0.000000e+00> : vector<8x8xf32>
    %196 = tpu.matmul %195, %181, %cst_67 {dimension_numbers = #tpu.dot_dimension_numbers<[1], [0], [0], [1], [0, 0, 1, 1], [], []>} : vector<8x8xbf16>, vector<8x8xbf16>, vector<8x8xf32> -> vector<8x8xf32>
    %197 = vector.extract_strided_slice %152 {offsets = [0, 16], sizes = [8, 8], strides = [1, 1]} : vector<8x32xf32> to vector<8x8xf32>
    %198 = arith.truncf %197 : vector<8x8xf32> to vector<8x8xbf16>
    %199 = vector.extract_strided_slice %153 {offsets = [0, 16], sizes = [8, 8], strides = [1, 1]} : vector<8x32xf32> to vector<8x8xf32>
    %200 = arith.truncf %199 : vector<8x8xf32> to vector<8x8xbf16>
    %201 = vector.extract_strided_slice %154 {offsets = [0, 16], sizes = [8, 8], strides = [1, 1]} : vector<8x32xf32> to vector<8x8xf32>
    %202 = arith.truncf %201 : vector<8x8xf32> to vector<8x8xbf16>
    %cst_68 = arith.constant dense<0.000000e+00> : vector<8x8xf32>
    %203 = tpu.matmul %198, %200, %cst_68 {dimension_numbers = #tpu.dot_dimension_numbers<[1], [1], [0], [0], [0, 0, 1, 0], [], []>} : vector<8x8xbf16>, vector<8x8xbf16>, vector<8x8xf32> -> vector<8x8xf32>
    %cst_69 = arith.constant 0.353553385 : f32
    %204 = vector.broadcast %cst_69 : f32 to vector<8x8xf32>
    %205 = arith.mulf %203, %204 : vector<8x8xf32>
    %cst_70 = arith.constant dense<0xFF800000> : vector<8xf32>
    %206 = vector.multi_reduction <maximumf>, %205, %cst_70 [1] : vector<8x8xf32> to vector<8xf32>
    %207 = vector.shape_cast %206 : vector<8xf32> to vector<8x1xf32>
    %208 = vector.broadcast %207 : vector<8x1xf32> to vector<8x8xf32>
    %209 = arith.subf %205, %208 : vector<8x8xf32>
    %210 = math.exp %209 : vector<8x8xf32>
    %cst_71 = arith.constant dense<0.000000e+00> : vector<8xf32>
    %211 = vector.multi_reduction <add>, %210, %cst_71 [1] : vector<8x8xf32> to vector<8xf32>
    %212 = vector.shape_cast %211 : vector<8xf32> to vector<8x1xf32>
    %213 = tpu.reciprocal %212 {approx = true} : vector<8x1xf32> -> vector<8x1xf32>
    %214 = vector.broadcast %213 : vector<8x1xf32> to vector<8x8xf32>
    %215 = arith.mulf %210, %214 : vector<8x8xf32>
    %216 = arith.truncf %215 : vector<8x8xf32> to vector<8x8xbf16>
    %cst_72 = arith.constant dense<0.000000e+00> : vector<8x8xf32>
    %217 = tpu.matmul %216, %202, %cst_72 {dimension_numbers = #tpu.dot_dimension_numbers<[1], [0], [0], [1], [0, 0, 1, 1], [], []>} : vector<8x8xbf16>, vector<8x8xbf16>, vector<8x8xf32> -> vector<8x8xf32>
    %218 = vector.extract_strided_slice %152 {offsets = [0, 24], sizes = [8, 8], strides = [1, 1]} : vector<8x32xf32> to vector<8x8xf32>
    %219 = arith.truncf %218 : vector<8x8xf32> to vector<8x8xbf16>
    %220 = vector.extract_strided_slice %153 {offsets = [0, 24], sizes = [8, 8], strides = [1, 1]} : vector<8x32xf32> to vector<8x8xf32>
    %221 = arith.truncf %220 : vector<8x8xf32> to vector<8x8xbf16>
    %222 = vector.extract_strided_slice %154 {offsets = [0, 24], sizes = [8, 8], strides = [1, 1]} : vector<8x32xf32> to vector<8x8xf32>
    %223 = arith.truncf %222 : vector<8x8xf32> to vector<8x8xbf16>
    %cst_73 = arith.constant dense<0.000000e+00> : vector<8x8xf32>
    %224 = tpu.matmul %219, %221, %cst_73 {dimension_numbers = #tpu.dot_dimension_numbers<[1], [1], [0], [0], [0, 0, 1, 0], [], []>} : vector<8x8xbf16>, vector<8x8xbf16>, vector<8x8xf32> -> vector<8x8xf32>
    %cst_74 = arith.constant 0.353553385 : f32
    %225 = vector.broadcast %cst_74 : f32 to vector<8x8xf32>
    %226 = arith.mulf %224, %225 : vector<8x8xf32>
    %cst_75 = arith.constant dense<0xFF800000> : vector<8xf32>
    %227 = vector.multi_reduction <maximumf>, %226, %cst_75 [1] : vector<8x8xf32> to vector<8xf32>
    %228 = vector.shape_cast %227 : vector<8xf32> to vector<8x1xf32>
    %229 = vector.broadcast %228 : vector<8x1xf32> to vector<8x8xf32>
    %230 = arith.subf %226, %229 : vector<8x8xf32>
    %231 = math.exp %230 : vector<8x8xf32>
    %cst_76 = arith.constant dense<0.000000e+00> : vector<8xf32>
    %232 = vector.multi_reduction <add>, %231, %cst_76 [1] : vector<8x8xf32> to vector<8xf32>
    %233 = vector.shape_cast %232 : vector<8xf32> to vector<8x1xf32>
    %234 = tpu.reciprocal %233 {approx = true} : vector<8x1xf32> -> vector<8x1xf32>
    %235 = vector.broadcast %234 : vector<8x1xf32> to vector<8x8xf32>
    %236 = arith.mulf %231, %235 : vector<8x8xf32>
    %237 = arith.truncf %236 : vector<8x8xf32> to vector<8x8xbf16>
    %cst_77 = arith.constant dense<0.000000e+00> : vector<8x8xf32>
    %238 = tpu.matmul %237, %223, %cst_77 {dimension_numbers = #tpu.dot_dimension_numbers<[1], [0], [0], [1], [0, 0, 1, 1], [], []>} : vector<8x8xbf16>, vector<8x8xbf16>, vector<8x8xf32> -> vector<8x8xf32>
    %239 = tpu.concatenate %175, %196, %217, %238 in 1 : vector<8x8xf32>, vector<8x8xf32>, vector<8x8xf32>, vector<8x8xf32> -> vector<8x32xf32>
    %c0_78 = arith.constant 0 : index
    %c0_79 = arith.constant 0 : index
    %c0_80 = arith.constant 0 : index
    %240 = vector.load %arg14[%c0_78, %c0_79, %c0_80] : memref<1x32x32xbf16, #tpu.memory_space<vmem>>, vector<1x32x32xbf16>
    %241 = vector.shape_cast %240 : vector<1x32x32xbf16> to vector<32x32xbf16>
    %242 = arith.truncf %239 : vector<8x32xf32> to vector<8x32xbf16>
    %cst_81 = arith.constant dense<0.000000e+00> : vector<8x32xf32>
    %243 = tpu.matmul %242, %241, %cst_81 {dimension_numbers = #tpu.dot_dimension_numbers<[1], [0], [0], [1], [0, 0, 1, 1], [], []>} : vector<8x32xbf16>, vector<32x32xbf16>, vector<8x32xf32> -> vector<8x32xf32>
    %244 = arith.addf %143, %243 : vector<8x32xf32>
    %c0_82 = arith.constant 0 : index
    %c0_83 = arith.constant 0 : index
    %c0_84 = arith.constant 0 : index
    %245 = vector.load %arg15[%c0_82, %c0_83, %c0_84] : memref<1x1x32xf32, #tpu.memory_space<vmem>>, vector<1x1x32xf32>
    %246 = vector.shape_cast %245 : vector<1x1x32xf32> to vector<1x32xf32>
    %247 = vector.broadcast %246 : vector<1x32xf32> to vector<8x32xf32>
    %248 = arith.addf %244, %247 : vector<8x32xf32>
    %c0_85 = arith.constant 0 : index
    %c0_86 = arith.constant 0 : index
    %c0_87 = arith.constant 0 : index
    %249 = vector.load %arg16[%c0_85, %c0_86, %c0_87] : memref<1x1x32xf32, #tpu.memory_space<vmem>>, vector<1x1x32xf32>
    %250 = vector.shape_cast %249 : vector<1x1x32xf32> to vector<1x32xf32>
    %c0_88 = arith.constant 0 : index
    %c0_89 = arith.constant 0 : index
    %c0_90 = arith.constant 0 : index
    %251 = vector.load %arg17[%c0_88, %c0_89, %c0_90] : memref<1x1x32xf32, #tpu.memory_space<vmem>>, vector<1x1x32xf32>
    %252 = vector.shape_cast %251 : vector<1x1x32xf32> to vector<1x32xf32>
    %cst_91 = arith.constant dense<0.000000e+00> : vector<8xf32>
    %253 = vector.multi_reduction <add>, %248, %cst_91 [1] : vector<8x32xf32> to vector<8xf32>
    %254 = vector.shape_cast %253 : vector<8xf32> to vector<8x1xf32>
    %cst_92 = arith.constant 3.200000e+01 : f32
    %255 = vector.broadcast %cst_92 : f32 to vector<8x1xf32>
    %256 = arith.divf %254, %255 : vector<8x1xf32>
    %257 = vector.broadcast %256 : vector<8x1xf32> to vector<8x32xf32>
    %258 = arith.subf %248, %257 : vector<8x32xf32>
    %259 = arith.mulf %258, %258 : vector<8x32xf32>
    %cst_93 = arith.constant dense<0.000000e+00> : vector<8xf32>
    %260 = vector.multi_reduction <add>, %259, %cst_93 [1] : vector<8x32xf32> to vector<8xf32>
    %261 = vector.shape_cast %260 : vector<8xf32> to vector<8x1xf32>
    %cst_94 = arith.constant 3.200000e+01 : f32
    %262 = vector.broadcast %cst_94 : f32 to vector<8x1xf32>
    %263 = arith.divf %261, %262 : vector<8x1xf32>
    %264 = vector.broadcast %256 : vector<8x1xf32> to vector<8x32xf32>
    %265 = arith.subf %248, %264 : vector<8x32xf32>
    %cst_95 = arith.constant 9.99999974E-6 : f32
    %266 = vector.broadcast %cst_95 : f32 to vector<8x1xf32>
    %267 = arith.addf %263, %266 : vector<8x1xf32>
    %268 = math.rsqrt %267 : vector<8x1xf32>
    %269 = vector.broadcast %268 : vector<8x1xf32> to vector<8x32xf32>
    %270 = arith.mulf %265, %269 : vector<8x32xf32>
    %271 = vector.broadcast %250 : vector<1x32xf32> to vector<8x32xf32>
    %272 = arith.mulf %270, %271 : vector<8x32xf32>
    %273 = vector.broadcast %252 : vector<1x32xf32> to vector<8x32xf32>
    %274 = arith.addf %272, %273 : vector<8x32xf32>
    %c0_96 = arith.constant 0 : index
    %c0_97 = arith.constant 0 : index
    %c0_98 = arith.constant 0 : index
    %275 = vector.load %arg18[%c0_96, %c0_97, %c0_98] : memref<1x32x128xbf16, #tpu.memory_space<vmem>>, vector<1x32x128xbf16>
    %276 = vector.shape_cast %275 : vector<1x32x128xbf16> to vector<32x128xbf16>
    %277 = arith.truncf %274 : vector<8x32xf32> to vector<8x32xbf16>
    %cst_99 = arith.constant dense<0.000000e+00> : vector<8x128xf32>
    %278 = tpu.matmul %277, %276, %cst_99 {dimension_numbers = #tpu.dot_dimension_numbers<[1], [0], [0], [1], [0, 0, 1, 1], [], []>} : vector<8x32xbf16>, vector<32x128xbf16>, vector<8x128xf32> -> vector<8x128xf32>
    %c0_100 = arith.constant 0 : index
    %c0_101 = arith.constant 0 : index
    %c0_102 = arith.constant 0 : index
    %279 = vector.load %arg19[%c0_100, %c0_101, %c0_102] : memref<1x1x128xf32, #tpu.memory_space<vmem>>, vector<1x1x128xf32>
    %280 = vector.shape_cast %279 : vector<1x1x128xf32> to vector<1x128xf32>
    %281 = vector.broadcast %280 : vector<1x128xf32> to vector<8x128xf32>
    %282 = arith.addf %278, %281 : vector<8x128xf32>
    %283 = arith.mulf %282, %282 : vector<8x128xf32>
    %284 = arith.mulf %282, %283 : vector<8x128xf32>
    %cst_103 = arith.constant 4.471500e-02 : f32
    %285 = vector.broadcast %cst_103 : f32 to vector<8x128xf32>
    %286 = arith.mulf %285, %284 : vector<8x128xf32>
    %287 = arith.addf %282, %286 : vector<8x128xf32>
    %cst_104 = arith.constant 0.797884583 : f32
    %288 = vector.broadcast %cst_104 : f32 to vector<8x128xf32>
    %289 = arith.mulf %288, %287 : vector<8x128xf32>
    %290 = math.tanh %289 : vector<8x128xf32>
    %cst_105 = arith.constant 1.000000e+00 : f32
    %291 = vector.broadcast %cst_105 : f32 to vector<8x128xf32>
    %292 = arith.addf %291, %290 : vector<8x128xf32>
    %cst_106 = arith.constant 5.000000e-01 : f32
    %293 = vector.broadcast %cst_106 : f32 to vector<8x128xf32>
    %294 = arith.mulf %293, %292 : vector<8x128xf32>
    %295 = arith.mulf %282, %294 : vector<8x128xf32>
    %c0_107 = arith.constant 0 : index
    %c0_108 = arith.constant 0 : index
    %c0_109 = arith.constant 0 : index
    %296 = vector.load %arg20[%c0_107, %c0_108, %c0_109] : memref<1x128x32xbf16, #tpu.memory_space<vmem>>, vector<1x128x32xbf16>
    %297 = vector.shape_cast %296 : vector<1x128x32xbf16> to vector<128x32xbf16>
    %298 = arith.truncf %295 : vector<8x128xf32> to vector<8x128xbf16>
    %cst_110 = arith.constant dense<0.000000e+00> : vector<8x32xf32>
    %299 = tpu.matmul %298, %297, %cst_110 {dimension_numbers = #tpu.dot_dimension_numbers<[1], [0], [0], [1], [0, 0, 1, 1], [], []>} : vector<8x128xbf16>, vector<128x32xbf16>, vector<8x32xf32> -> vector<8x32xf32>
    %300 = arith.addf %274, %299 : vector<8x32xf32>
    %c0_111 = arith.constant 0 : index
    %c0_112 = arith.constant 0 : index
    %c0_113 = arith.constant 0 : index
    %301 = vector.load %arg21[%c0_111, %c0_112, %c0_113] : memref<1x1x32xf32, #tpu.memory_space<vmem>>, vector<1x1x32xf32>
    %302 = vector.shape_cast %301 : vector<1x1x32xf32> to vector<1x32xf32>
    %303 = vector.broadcast %302 : vector<1x32xf32> to vector<8x32xf32>
    %304 = arith.addf %300, %303 : vector<8x32xf32>
    %c0_114 = arith.constant 0 : index
    %c0_115 = arith.constant 0 : index
    %c0_116 = arith.constant 0 : index
    %305 = vector.load %arg22[%c0_114, %c0_115, %c0_116] : memref<1x1x32xf32, #tpu.memory_space<vmem>>, vector<1x1x32xf32>
    %306 = vector.shape_cast %305 : vector<1x1x32xf32> to vector<1x32xf32>
    %c0_117 = arith.constant 0 : index
    %c0_118 = arith.constant 0 : index
    %c0_119 = arith.constant 0 : index
    %307 = vector.load %arg23[%c0_117, %c0_118, %c0_119] : memref<1x1x32xf32, #tpu.memory_space<vmem>>, vector<1x1x32xf32>
    %308 = vector.shape_cast %307 : vector<1x1x32xf32> to vector<1x32xf32>
    %cst_120 = arith.constant dense<0.000000e+00> : vector<8xf32>
    %309 = vector.multi_reduction <add>, %304, %cst_120 [1] : vector<8x32xf32> to vector<8xf32>
    %310 = vector.shape_cast %309 : vector<8xf32> to vector<8x1xf32>
    %cst_121 = arith.constant 3.200000e+01 : f32
    %311 = vector.broadcast %cst_121 : f32 to vector<8x1xf32>
    %312 = arith.divf %310, %311 : vector<8x1xf32>
    %313 = vector.broadcast %312 : vector<8x1xf32> to vector<8x32xf32>
    %314 = arith.subf %304, %313 : vector<8x32xf32>
    %315 = arith.mulf %314, %314 : vector<8x32xf32>
    %cst_122 = arith.constant dense<0.000000e+00> : vector<8xf32>
    %316 = vector.multi_reduction <add>, %315, %cst_122 [1] : vector<8x32xf32> to vector<8xf32>
    %317 = vector.shape_cast %316 : vector<8xf32> to vector<8x1xf32>
    %cst_123 = arith.constant 3.200000e+01 : f32
    %318 = vector.broadcast %cst_123 : f32 to vector<8x1xf32>
    %319 = arith.divf %317, %318 : vector<8x1xf32>
    %320 = vector.broadcast %312 : vector<8x1xf32> to vector<8x32xf32>
    %321 = arith.subf %304, %320 : vector<8x32xf32>
    %cst_124 = arith.constant 9.99999974E-6 : f32
    %322 = vector.broadcast %cst_124 : f32 to vector<8x1xf32>
    %323 = arith.addf %319, %322 : vector<8x1xf32>
    %324 = math.rsqrt %323 : vector<8x1xf32>
    %325 = vector.broadcast %324 : vector<8x1xf32> to vector<8x32xf32>
    %326 = arith.mulf %321, %325 : vector<8x32xf32>
    %327 = vector.broadcast %306 : vector<1x32xf32> to vector<8x32xf32>
    %328 = arith.mulf %326, %327 : vector<8x32xf32>
    %329 = vector.broadcast %308 : vector<1x32xf32> to vector<8x32xf32>
    %330 = arith.addf %328, %329 : vector<8x32xf32>
    %c0_125 = arith.constant 0 : index
    %c0_126 = arith.constant 0 : index
    %c0_127 = arith.constant 0 : index
    %331 = vector.load %arg24[%c0_125, %c0_126, %c0_127] : memref<1x8x32xf32, #tpu.memory_space<vmem>>, vector<1x8x32xf32>
    %332 = vector.shape_cast %331 : vector<1x8x32xf32> to vector<8x32xf32>
    %333 = vector.shape_cast %330 : vector<8x32xf32> to vector<1x8x32xf32>
    tpu.vector_store %arg24[%c0_125, %c0_126, %c0_127], %333 {strides = array<i32>} : memref<1x8x32xf32, #tpu.memory_space<vmem>>, vector<1x8x32xf32>,
    return
  }
  func.func @transform_0(%arg0: i32) -> (i32, i32, i32) {
    %c0_i32 = arith.constant 0 : i32
    %c0_i32_0 = arith.constant 0 : i32
    %c0_i32_1 = arith.constant 0 : i32
    return %arg0, %c0_i32, %c0_i32_0 : i32, i32, i32
  }
  func.func @transform_1(%arg0: i32) -> (i32, i32, i32) {
    %c0_i32 = arith.constant 0 : i32
    %c0_i32_0 = arith.constant 0 : i32
    %c0_i32_1 = arith.constant 0 : i32
    return %arg0, %c0_i32, %c0_i32_0 : i32, i32, i32
  }
  func.func @transform_2(%arg0: i32) -> (i32, i32, i32) {
    %c0_i32 = arith.constant 0 : i32
    %c0_i32_0 = arith.constant 0 : i32
    %c0_i32_1 = arith.constant 0 : i32
    return %arg0, %c0_i32, %c0_i32_0 : i32, i32, i32
  }
  func.func @transform_3(%arg0: i32) -> (i32, i32) {
    %c0_i32 = arith.constant 0 : i32
    %c0_i32_0 = arith.constant 0 : i32
    %c0_i32_1 = arith.constant 0 : i32
    return %c0_i32, %c0_i32_0 : i32, i32
  }
  func.func @transform_4(%arg0: i32) -> (i32, i32) {
    %c0_i32 = arith.constant 0 : i32
    %c0_i32_0 = arith.constant 0 : i32
    %c0_i32_1 = arith.constant 0 : i32
    return %c0_i32, %c0_i32_0 : i32, i32
  }
  func.func @transform_5(%arg0: i32) -> (i32, i32) {
    %c0_i32 = arith.constant 0 : i32
    %c0_i32_0 = arith.constant 0 : i32
    %c0_i32_1 = arith.constant 0 : i32
    return %c0_i32, %c0_i32_0 : i32, i32
  }
  func.func @transform_6(%arg0: i32) -> (i32, i32) {
    %c0_i32 = arith.constant 0 : i32
    %c0_i32_0 = arith.constant 0 : i32
    %c0_i32_1 = arith.constant 0 : i32
    return %c0_i32, %c0_i32_0 : i32, i32
  }
  func.func @transform_7(%arg0: i32) -> (i32, i32) {
    %c0_i32 = arith.constant 0 : i32
    %c0_i32_0 = arith.constant 0 : i32
    %c0_i32_1 = arith.constant 0 : i32
    return %c0_i32, %c0_i32_0 : i32, i32
  }
  func.func @transform_8(%arg0: i32) -> (i32, i32) {
    %c0_i32 = arith.constant 0 : i32
    %c0_i32_0 = arith.constant 0 : i32
    %c0_i32_1 = arith.constant 0 : i32
    return %c0_i32, %c0_i32_0 : i32, i32
  }
  func.func @transform_9(%arg0: i32) -> (i32, i32) {
    %c0_i32 = arith.constant 0 : i32
    %c0_i32_0 = arith.constant 0 : i32
    %c0_i32_1 = arith.constant 0 : i32
    return %c0_i32, %c0_i32_0 : i32, i32
  }
  func.func @transform_10(%arg0: i32) -> (i32, i32) {
    %c0_i32 = arith.constant 0 : i32
    %c0_i32_0 = arith.constant 0 : i32
    %c0_i32_1 = arith.constant 0 : i32
    return %c0_i32, %c0_i32_0 : i32, i32
  }
  func.func @transform_11(%arg0: i32) -> (i32, i32, i32) {
    %c0_i32 = arith.constant 0 : i32
    %c0_i32_0 = arith.constant 0 : i32
    %c0_i32_1 = arith.constant 0 : i32
    %c0_i32_2 = arith.constant 0 : i32
    return %c0_i32, %c0_i32_0, %c0_i32_1 : i32, i32, i32
  }
  func.func @transform_12(%arg0: i32) -> (i32, i32, i32) {
    %c0_i32 = arith.constant 0 : i32
    %c0_i32_0 = arith.constant 0 : i32
    %c0_i32_1 = arith.constant 0 : i32
    %c0_i32_2 = arith.constant 0 : i32
    return %c0_i32, %c0_i32_0, %c0_i32_1 : i32, i32, i32
  }
  func.func @transform_13(%arg0: i32) -> (i32, i32, i32) {
    %c0_i32 = arith.constant 0 : i32
    %c0_i32_0 = arith.constant 0 : i32
    %c0_i32_1 = arith.constant 0 : i32
    %c0_i32_2 = arith.constant 0 : i32
    return %c0_i32, %c0_i32_0, %c0_i32_1 : i32, i32, i32
  }
  func.func @transform_14(%arg0: i32) -> (i32, i32, i32) {
    %c0_i32 = arith.constant 0 : i32
    %c0_i32_0 = arith.constant 0 : i32
    %c0_i32_1 = arith.constant 0 : i32
    %c0_i32_2 = arith.constant 0 : i32
    return %c0_i32, %c0_i32_0, %c0_i32_1 : i32, i32, i32
  }
  func.func @transform_15(%arg0: i32) -> (i32, i32, i32) {
    %c0_i32 = arith.constant 0 : i32
    %c0_i32_0 = arith.constant 0 : i32
    %c0_i32_1 = arith.constant 0 : i32
    %c0_i32_2 = arith.constant 0 : i32
    return %c0_i32, %c0_i32_0, %c0_i32_1 : i32, i32, i32
  }
  func.func @transform_16(%arg0: i32) -> (i32, i32, i32) {
    %c0_i32 = arith.constant 0 : i32
    %c0_i32_0 = arith.constant 0 : i32
    %c0_i32_1 = arith.constant 0 : i32
    %c0_i32_2 = arith.constant 0 : i32
    return %c0_i32, %c0_i32_0, %c0_i32_1 : i32, i32, i32
  }
  func.func @transform_17(%arg0: i32) -> (i32, i32, i32) {
    %c0_i32 = arith.constant 0 : i32
    %c0_i32_0 = arith.constant 0 : i32
    %c0_i32_1 = arith.constant 0 : i32
    %c0_i32_2 = arith.constant 0 : i32
    return %c0_i32, %c0_i32_0, %c0_i32_1 : i32, i32, i32
  }
  func.func @transform_18(%arg0: i32) -> (i32, i32, i32) {
    %c0_i32 = arith.constant 0 : i32
    %c0_i32_0 = arith.constant 0 : i32
    %c0_i32_1 = arith.constant 0 : i32
    %c0_i32_2 = arith.constant 0 : i32
    return %c0_i32, %c0_i32_0, %c0_i32_1 : i32, i32, i32
  }
  func.func @transform_19(%arg0: i32) -> (i32, i32, i32) {
    %c0_i32 = arith.constant 0 : i32
    %c0_i32_0 = arith.constant 0 : i32
    %c0_i32_1 = arith.constant 0 : i32
    %c0_i32_2 = arith.constant 0 : i32
    return %c0_i32, %c0_i32_0, %c0_i32_1 : i32, i32, i32
  }
  func.func @transform_20(%arg0: i32) -> (i32, i32, i32) {
    %c0_i32 = arith.constant 0 : i32
    %c0_i32_0 = arith.constant 0 : i32
    %c0_i32_1 = arith.constant 0 : i32
    %c0_i32_2 = arith.constant 0 : i32
    return %c0_i32, %c0_i32_0, %c0_i32_1 : i32, i32, i32
  }
  func.func @transform_21(%arg0: i32) -> (i32, i32, i32) {
    %c0_i32 = arith.constant 0 : i32
    %c0_i32_0 = arith.constant 0 : i32
    %c0_i32_1 = arith.constant 0 : i32
    %c0_i32_2 = arith.constant 0 : i32
    return %c0_i32, %c0_i32_0, %c0_i32_1 : i32, i32, i32
  }
  func.func @transform_22(%arg0: i32) -> (i32, i32, i32) {
    %c0_i32 = arith.constant 0 : i32
    %c0_i32_0 = arith.constant 0 : i32
    %c0_i32_1 = arith.constant 0 : i32
    %c0_i32_2 = arith.constant 0 : i32
    return %c0_i32, %c0_i32_0, %c0_i32_1 : i32, i32, i32
  }
  func.func @transform_23(%arg0: i32) -> (i32, i32, i32) {
    %c0_i32 = arith.constant 0 : i32
    %c0_i32_0 = arith.constant 0 : i32
    %c0_i32_1 = arith.constant 0 : i32
    return %arg0, %c0_i32, %c0_i32_0 : i32, i32, i32
  }
}

</mosaic_0001>

<bundles_post_ra>
// kernel: tpu_custom_call.1
= control target key start
LH: loop header
LB: loop body
LE: loop exit
PB: predicated region body
PF: predicated region fallthrough
CT: control target
= control target key end

     0   :  { %s4403_s0 = inlined_call_operand.vmem [shape: f32[2,8,32], index: 0, kind: input, shape index: {}]   ;;  %s4404_s1 = inlined_call_operand.vmem [shape: f32[2,16,32], index: 1, kind: input, shape index: {}]   ;;  %s4405_s2 = inlined_call_operand.hbm [shape: f32[2,1,16], index: 2, kind: input, shape index: {}]   ;;  %s4406_s3 = inlined_call_operand.vmem [shape: bf16[32,32], index: 3, kind: input, shape index: {}]   ;;  %s4407_s4 = inlined_call_operand.hbm [shape: f32[1,32], index: 4, kind: input, shape index: {}]   ;;  %s4408_s5 = inlined_call_operand.vmem [shape: bf16[32,64], index: 5, kind: input, shape index: {}]   ;;  %s4409_s6 = inlined_call_operand.hbm [shape: f32[1,64], index: 6, kind: input, shape index: {}]   ;;  %s4410_s7 = inlined_call_operand.hbm [shape: bf16[32,32], index: 7, kind: input, shape index: {}]   ;;  %s4411_s8 = inlined_call_operand.hbm [shape: f32[1,32], index: 8, kind: input, shape index: {}]   ;;  %s4412_s9 = inlined_call_operand.hbm [shape: f32[1,32], index: 9, kind: input, shape index: {}]   ;;  %s4413_s10 = inlined_call_operand.hbm [shape: f32[1,32], index: 10, kind: input, shape index: {}]   ;;  %s4414_s11 = inlined_call_operand.vmem [shape: bf16[1,32,96], index: 11, kind: input, shape index: {}]   ;;  %s4415_s12 = inlined_call_operand.hbm [shape: f32[1,1,96], index: 12, kind: input, shape index: {}]   ;;  %s4416_s13 = inlined_call_operand.vmem [shape: bf16[1,32,32], index: 13, kind: input, shape index: {}]   ;;  %s4417_s14 = inlined_call_operand.hbm [shape: f32[1,1,32], index: 14, kind: input, shape index: {}]   ;;  %s4418_s15 = inlined_call_operand.hbm [shape: f32[1,1,32], index: 15, kind: input, shape index: {}]   ;;  %s4419_s16 = inlined_call_operand.hbm [shape: f32[1,1,32], index: 16, kind: input, shape index: {}]   ;;  %s4420_s17 = inlined_call_operand.vmem [shape: bf16[1,32,128], index: 17, kind: input, shape index: {}]   ;;  %s4421_s18 = inlined_call_operand.vmem [shape: f32[1,1,128], index: 18, kind: input, shape index: {}]   ;;  %s4422_s19 = inlined_call_operand.vmem [shape: bf16[1,128,32], index: 19, kind: input, shape index: {}]   ;;  %s4423_s20 = inlined_call_operand.vmem [shape: f32[1,1,32], index: 20, kind: input, shape index: {}]   ;;  %s4424_s21 = inlined_call_operand.vmem [shape: f32[1,1,32], index: 21, kind: input, shape index: {}]   ;;  %s4425_s22 = inlined_call_operand.vmem [shape: f32[1,1,32], index: 22, kind: input, shape index: {}]   ;;  %s4426_s23 = inlined_call_operand.hbm [shape: f32[2,8,32], index: 23, kind: output, shape index: {}]  }
   0x1   :  { %4446 = sst [smem:[#allocation28_spill]] %s4403_s0 }
   0x2   :  { %4447 = sst [smem:[#allocation29_spill]] %s4404_s1 }
   0x3   :  { %4448 = sst [smem:[#allocation30_spill]] %s4405_s2 }
   0x4   :  { %4449 = sst [smem:[#allocation31_spill]] %s4406_s3 }
   0x5   :  { %4450 = sst [smem:[#allocation32_spill]] %s4407_s4 }
   0x6   :  { %4451 = sst [smem:[#allocation33_spill]] %s4408_s5 }
   0x7   :  { %4452 = sst [smem:[#allocation34_spill]] %s4409_s6 }
   0x8   :  { %4453 = sst [smem:[#allocation35_spill]] %s4410_s7 }
   0x9   :  { %4454 = sst [smem:[#allocation36_spill]] %s4411_s8 }
   0xa   :  { %4455 = sst [smem:[#allocation37_spill]] %s4412_s9 }
   0xb   :  { %4456 = sst [smem:[#allocation38_spill]] %s4413_s10 }
   0xc   :  { %4457 = sst [smem:[#allocation39_spill]] %s4414_s11 }
   0xd   :  { %4458 = sst [smem:[#allocation40_spill]] %s4415_s12 }
   0xe   :  { %4459 = sst [smem:[#allocation41_spill]] %s4416_s13 }
   0xf   :  { %4460 = sst [smem:[#allocation42_spill]] %s4420_s17 }
  0x10   :  { %4461 = sst [smem:[#allocation43_spill]] %s4421_s18 }
  0x11   :  { %4462 = sst [smem:[#allocation44_spill]] %s4422_s19 }
  0x12   :  { %4463 = sst [smem:[#allocation45_spill]] %s4423_s20 }
  0x13   :  { %4464 = sst [smem:[#allocation46_spill]] %s4424_s21 }
  0x14   :  { %4465 = sst [smem:[#allocation47_spill]] %s4425_s22 }
  0x15   :  { %4466 = sst [smem:[#allocation48_spill]] %s4426_s23 }
  0x16   :  { %28 = vsyncpa [#allocation3], 0 }
  0x17   :  { %30 = vsyncpa [#allocation3 + $0x1], 0 }
  0x18   :  { %31 = vsyncpa [#allocation6], 0 }
  0x19   :  { %32 = vsyncpa [#allocation9], 0 }
  0x1a   :  { %33 = vsyncpa [#allocation12], 0 }
  0x1b   :  { %34 = vsyncpa [#allocation15], 0 }
  0x1c   :  { %35 = vsyncpa [#allocation18], 0 }
  0x1d   :  { %36 = vsyncpa [#allocation4], 0 }
  0x1e   :  { %38 = vsyncpa [#allocation4 + $0x1], 0  ;;  %s3722_s4 = smov 0   ;;  %s3724_s30 = smov 0  }
  0x1f   :  { %s3726_s24 = smov 0   ;;  %s3728_s25 = smov 0  }
  0x20 LB: > { %s3572_s5 = smov [#allocation5]   ;;  %s3743_s26 = sadd.s32 4294967295, %s3570_s25   ;;  %s3570_s25 = sphi %s3728_s25, %s4518_s25   ;;  %s3566_s24 = sphi %s3726_s24, %s4517_s24   ;;  %s3562_s30 = sphi %s3724_s30, %s4516_s30   ;;  %s3558_s4 = sphi %s3722_s4, %s4515_s4  }
  0x21   : > { %s589_s1 = sshll.u32 %s3572_s5, 4  ;;  %p2637_p0 = scmp.ge.s32.totalorder %s3570_s25, 1  ;;  %s3748_s1 = int_to_ptr.vmem [resolvable:$true] %s589_s1 }
  0x22   : > { %p4437_p1 = scmp.eq.s32.totalorder %s3743_s26, 0  ;;  %p573_p2 = scmp.lt.s32.totalorder %s3570_s25, 3 }
  0x23   : > { %s3573_s6 = smov [#allocation8]   ;;  %s3574_s28 = smov [#allocation11]  }
  0x24   : > { %p3750_p3 = pnand %p2637_p0, %p573_p2  ;;  %s613_s27 = sshll.u32 %s3573_s6, 4  ;;  %s3757_s27 = int_to_ptr.vmem [resolvable:$true] %s613_s27 }
  0x25   : > { %s638_s29 = sshll.u32 %s3574_s28, 4  ;;  %s4469_s5 = sld [smem:[#allocation32_spill]]  ;;  %s3765_s29 = int_to_ptr.vmem [resolvable:$true] %s638_s29 }
  0x26   : > { %s4467_s2 = scalar_select %p3750_p3, 1, 0 }
  0x27   : > { %p2993_p5 = pneg %p3750_p3 }
  0x29   : > { %p3761_p6 = pnand %p2993_p5, %p4437_p1 }
  0x2b   : > { %s3174_s23 = scalar_lea.hbm %s4469_s5, 16  ;;  %p3775_p8 = pneg %p3761_p6 }
  0x2c   : > { %p3175_p7 = scmp.ne.s32.totalorder %s4469_s5, %s3174_s23  ;;  %p3181_p11 = scmp.lt.u32.totalorder %s3174_s23, %s4469_s5 }
  0x2e   : > { %p3177_p9 = pnand %p3775_p8, %p3175_p7 }
  0x30   : > { %p3178_p10 = pneg %p3177_p9 }
  0x32   : > { %p3183_p12 = pnand %p3181_p11, %p3178_p10 }
  0x34   : > { %3186 = shalt.err (!%p3183_p12)
}
  0x35   : > { %s3187_s21 = scalar_lea.vmem %s3748_s1, 16  ;;  %s3194_s22 = scalar_lea.vmem %s3748_s1, 32 }
  0x36   : > { %p3188_p13 = scmp.ne.s32.totalorder %s3748_s1, %s3187_s21  ;;  %p3195_p5 = scmp.lt.s32.totalorder %s3748_s1, %s3748_s1 }
  0x37   : > { %p3196_p7 = scmp.lt.s32.totalorder %s3194_s22, %s3187_s21 }
  0x38   : > { %p3190_p0 = pnand %p3188_p13, %p3775_p8 }
  0x39   : > { %p3197_p9 = por %p3196_p7, %p3195_p5 }
  0x3a   : > { %p3191_p2 = pneg %p3190_p0 }
  0x3c   : > { %p3198_p4 = pnand %p3197_p9, %p3191_p2 }
  0x3e   : > { %3201 = shalt.err (!%p3198_p4)
}
  0x3f   : > { %2996 = dma.hbm_to_vmem [thread:$0]  (!%p3761_p6), %s4469_s5, 16, %s3748_s1, [#allocation6]  }
  0x40   : > { %s4471_s28 = sld [smem:[#allocation35_spill]] }
  0x46   : > { %s3202_s18 = scalar_lea.hbm %s4471_s28, 256 }
  0x47   : > { %p3203_p10 = scmp.ne.s32.totalorder %s4471_s28, %s3202_s18  ;;  %p3209_p4 = scmp.lt.u32.totalorder %s3202_s18, %s4471_s28 }
  0x49   : > { %p3205_p11 = pnand %p3203_p10, %p3775_p8 }
  0x4b   : > { %p3206_p12 = pneg %p3205_p11 }
  0x4d   : > { %p3211_p13 = pnand %p3209_p4, %p3206_p12 }
  0x4f   : > { %3214 = shalt.err (!%p3211_p13)
}
  0x50   : > { %s3215_s1 = scalar_lea.vmem %s3757_s27, 256  ;;  %p3223_p7 = scmp.lt.s32.totalorder %s3757_s27, %s3757_s27 }
  0x51   : > { %p3216_p0 = scmp.ne.s32.totalorder %s3757_s27, %s3215_s1  ;;  %p3224_p9 = scmp.lt.s32.totalorder %s3215_s1, %s3215_s1 }
  0x53   : > { %p3218_p2 = pnand %p3216_p0, %p3775_p8  ;;  %p3225_p10 = por %p3224_p9, %p3223_p7 }
  0x55   : > { %p3219_p5 = pneg %p3218_p2 }
  0x57   : > { %p3226_p11 = pnand %p3225_p10, %p3219_p5 }
  0x59   : > { %3229 = shalt.err (!%p3226_p11)
}
  0x5a   : > { %s3575_s17 = smov 64   ;;  %s3576_s18 = smov 4  }
  0x5b   : > { %3002 = dma.hbm_to_vmem [thread:$0]  (!%p3761_p6), %s4471_s28, 256, %s3757_s27, [#allocation9], %s3575_s17, %s3575_s17, %s3576_s18  }
  0x5c   : > { %s4472_s9 = sld [smem:[#allocation37_spill]] }
  0x62   : > { %s3230_s0 = scalar_lea.hbm %s4472_s9, 16 }
  0x63   : > { %p3231_p12 = scmp.ne.s32.totalorder %s4472_s9, %s3230_s0  ;;  %p3237_p0 = scmp.lt.u32.totalorder %s3230_s0, %s4472_s9 }
  0x65   : > { %p3233_p4 = pnand %p3231_p12, %p3775_p8 }
  0x67   : > { %p3234_p13 = pneg %p3233_p4 }
  0x69   : > { %p3239_p2 = pnand %p3237_p0, %p3234_p13 }
  0x6b   : > { %3242 = shalt.err (!%p3239_p2)
}
  0x6c   : > { %s3243_s27 = scalar_lea.vmem %s3765_s29, 16  ;;  %s3250_s17 = scalar_lea.vmem %s3765_s29, 32 }
  0x6d   : > { %p3244_p5 = scmp.ne.s32.totalorder %s3765_s29, %s3243_s27  ;;  %p3251_p10 = scmp.lt.s32.totalorder %s3765_s29, %s3765_s29 }
  0x6e   : > { %p3252_p11 = scmp.lt.s32.totalorder %s3250_s17, %s3243_s27 }
  0x6f   : > { %p3246_p7 = pnand %p3244_p5, %p3775_p8 }
  0x70   : > { %p3253_p12 = por %p3252_p11, %p3251_p10 }
  0x71   : > { %p3247_p9 = pneg %p3246_p7 }
  0x73   : > { %p3254_p4 = pnand %p3253_p12, %p3247_p9 }
  0x75   : > { %3257 = shalt.err (!%p3254_p4)
}
  0x76   : > { %3008 = dma.hbm_to_vmem [thread:$0]  (!%p3761_p6), %s4472_s9, 16, %s3765_s29, [#allocation12]  }
  0x77   : > { %s3577_s19 = smov [#allocation14]   ;;  %s3578_s23 = smov [#allocation17]  }
  0x78   : > { %s663_s20 = sshll.u32 %s3577_s19, 4  ;;  %s688_s3 = sshll.u32 %s3578_s23, 4  ;;  %s664_s20 = int_to_ptr.vmem [resolvable:$true] %s663_s20  ;;  %s689_s3 = int_to_ptr.vmem [resolvable:$true] %s688_s3 }
  0x79   : > { %s4473_s12 = sld [smem:[#allocation40_spill]] }
  0x7f   : > { %s3258_s22 = scalar_lea.hbm %s4473_s12, 16 }
  0x80   : > { %p3259_p13 = scmp.ne.s32.totalorder %s4473_s12, %s3258_s22  ;;  %p3265_p5 = scmp.lt.u32.totalorder %s3258_s22, %s4473_s12 }
  0x82   : > { %p3261_p0 = pnand %p3259_p13, %p3775_p8 }
  0x84   : > { %p3262_p2 = pneg %p3261_p0 }
  0x86   : > { %p3267_p7 = pnand %p3265_p5, %p3262_p2 }
  0x88   : > { %3270 = shalt.err (!%p3267_p7)
}
  0x89   : > { %s3271_s29 = scalar_lea.vmem %s664_s20, 16  ;;  %s3278_s18 = scalar_lea.vmem %s664_s20, 32 }
  0x8a   : > { %p3272_p9 = scmp.ne.s32.totalorder %s664_s20, %s3271_s29  ;;  %p3279_p12 = scmp.lt.s32.totalorder %s664_s20, %s664_s20 }
  0x8b   : > { %p3280_p4 = scmp.lt.s32.totalorder %s3278_s18, %s3271_s29 }
  0x8c   : > { %p3274_p10 = pnand %p3272_p9, %p3775_p8 }
  0x8d   : > { %p3281_p1 = por %p3280_p4, %p3279_p12 }
  0x8e   : > { %p3275_p11 = pneg %p3274_p10 }
  0x90   : > { %p3282_p3 = pnand %p3281_p1, %p3275_p11 }
  0x92   : > { %3285 = shalt.err (!%p3282_p3)
}
  0x93   : > { %3014 = dma.hbm_to_vmem [thread:$0]  (!%p3761_p6), %s4473_s12, 16, %s664_s20, [#allocation15]  }
  0x94   : > { %s3286_s22 = scalar_lea.hbm %s4418_s15, 16 }
  0x95   : > { %p3287_p13 = scmp.ne.s32.totalorder %s4418_s15, %s3286_s22  ;;  %p3293_p3 = scmp.lt.u32.totalorder %s3286_s22, %s4418_s15 }
  0x97   : > { %p3289_p0 = pnand %p3287_p13, %p3775_p8 }
  0x99   : > { %p3290_p1 = pneg %p3289_p0 }
  0x9b   : > { %p3295_p2 = pnand %p3293_p3, %p3290_p1 }
  0x9d   : > { %3298 = shalt.err (!%p3295_p2)
}
  0x9e   : > { %s3299_s29 = scalar_lea.vmem %s689_s3, 16  ;;  %s3306_s20 = scalar_lea.vmem %s689_s3, 32 }
  0x9f   : > { %p3300_p5 = scmp.ne.s32.totalorder %s689_s3, %s3299_s29  ;;  %p3307_p10 = scmp.lt.s32.totalorder %s689_s3, %s689_s3 }
  0xa0   : > { %p3308_p11 = scmp.lt.s32.totalorder %s3306_s20, %s3299_s29 }
  0xa1   : > { %p3302_p7 = pnand %p3300_p5, %p3775_p8 }
  0xa2   : > { %p3309_p12 = por %p3308_p11, %p3307_p10 }
  0xa3   : > { %p3303_p9 = pneg %p3302_p7 }
  0xa5   : > { %p3310_p4 = pnand %p3309_p12, %p3303_p9 }
  0xa7   : > { %3313 = shalt.err (!%p3310_p4)
}
  0xa8   : > { %3020 = dma.hbm_to_vmem [thread:$0]  (!%p3761_p6), %s4418_s15, 16, %s689_s3, [#allocation18]  }
  0xa9   : > { %s3579_s23 = smov [#allocation7]   ;;  %s3580_s21 = smov [#allocation10]  }
  0xaa   : > { %s603_s0 = sshll.u32 %s3579_s23, 4  ;;  %s627_s22 = sshll.u32 %s3580_s21, 4  ;;  %s604_s0 = int_to_ptr.vmem [resolvable:$true] %s603_s0  ;;  %s628_s22 = int_to_ptr.vmem [resolvable:$true] %s627_s22 }
  0xab   : > { %s4474_s17 = sld [smem:[#allocation34_spill]] }
  0xb1   : > { %s3314_s5 = scalar_lea.hbm %s4474_s17, 16 }
  0xb2   : > { %p3315_p13 = scmp.ne.s32.totalorder %s4474_s17, %s3314_s5  ;;  %p3321_p3 = scmp.lt.u32.totalorder %s3314_s5, %s4474_s17 }
  0xb4   : > { %p3317_p0 = pnand %p3315_p13, %p3775_p8 }
  0xb6   : > { %p3318_p1 = pneg %p3317_p0 }
  0xb8   : > { %p3323_p2 = pnand %p3321_p3, %p3318_p1 }
  0xba   : > { %3326 = shalt.err (!%p3323_p2)
}
  0xbb   : > { %s3327_s3 = scalar_lea.vmem %s604_s0, 16  ;;  %s3334_s19 = scalar_lea.vmem %s604_s0, 32 }
  0xbc   : > { %p3328_p5 = scmp.ne.s32.totalorder %s604_s0, %s3327_s3  ;;  %p3335_p10 = scmp.lt.s32.totalorder %s604_s0, %s604_s0 }
  0xbd   : > { %p3336_p11 = scmp.lt.s32.totalorder %s3334_s19, %s3327_s3 }
  0xbe   : > { %p3330_p7 = pnand %p3328_p5, %p3775_p8 }
  0xbf   : > { %p3337_p12 = por %p3336_p11, %p3335_p10 }
  0xc0   : > { %p3331_p9 = pneg %p3330_p7 }
  0xc2   : > { %p3338_p4 = pnand %p3337_p12, %p3331_p9 }
  0xc4   : > { %3341 = shalt.err (!%p3338_p4)
}
  0xc5   : > { %2999 = dma.hbm_to_vmem [thread:$0]  (!%p3761_p6), %s4474_s17, 16, %s604_s0, [#allocation6]  }
  0xc6   : > { %s4475_s8 = sld [smem:[#allocation36_spill]] }
  0xcc   : > { %s3342_s27 = scalar_lea.hbm %s4475_s8, 16 }
  0xcd   : > { %p3343_p13 = scmp.ne.s32.totalorder %s4475_s8, %s3342_s27  ;;  %p3349_p3 = scmp.lt.u32.totalorder %s3342_s27, %s4475_s8 }
  0xcf   : > { %p3345_p0 = pnand %p3343_p13, %p3775_p8 }
  0xd1   : > { %p3346_p1 = pneg %p3345_p0 }
  0xd3   : > { %p3351_p2 = pnand %p3349_p3, %p3346_p1 }
  0xd5   : > { %3354 = shalt.err (!%p3351_p2)
}
  0xd6   : > { %s3355_s3 = scalar_lea.vmem %s628_s22, 16  ;;  %s3362_s0 = scalar_lea.vmem %s628_s22, 32 }
  0xd7   : > { %p3356_p5 = scmp.ne.s32.totalorder %s628_s22, %s3355_s3  ;;  %p3363_p10 = scmp.lt.s32.totalorder %s628_s22, %s628_s22 }
  0xd8   : > { %p3364_p11 = scmp.lt.s32.totalorder %s3362_s0, %s3355_s3 }
  0xd9   : > { %p3358_p7 = pnand %p3356_p5, %p3775_p8 }
  0xda   : > { %p3365_p12 = por %p3364_p11, %p3363_p10 }
  0xdb   : > { %p3359_p9 = pneg %p3358_p7 }
  0xdd   : > { %p3366_p4 = pnand %p3365_p12, %p3359_p9 }
  0xdf   : > { %3369 = shalt.err (!%p3366_p4)
}
  0xe0   : > { %3005 = dma.hbm_to_vmem [thread:$0]  (!%p3761_p6), %s4475_s8, 16, %s628_s22, [#allocation9]  }
  0xe1   : > { %s3581_s21 = smov [#allocation13]   ;;  %s3582_s1 = smov [#allocation16]  }
  0xe2   : > { %s649_s9 = sshll.u32 %s3581_s21, 4  ;;  %s677_s27 = sshll.u32 %s3582_s1, 4  ;;  %s650_s9 = int_to_ptr.vmem [resolvable:$true] %s649_s9  ;;  %s678_s27 = int_to_ptr.vmem [resolvable:$true] %s677_s27 }
  0xe3   : > { %s4476_s10 = sld [smem:[#allocation38_spill]] }
  0xe9   : > { %s3370_s20 = scalar_lea.hbm %s4476_s10, 16 }
  0xea   : > { %p3371_p13 = scmp.ne.s32.totalorder %s4476_s10, %s3370_s20  ;;  %p3377_p3 = scmp.lt.u32.totalorder %s3370_s20, %s4476_s10 }
  0xec   : > { %p3373_p0 = pnand %p3371_p13, %p3775_p8 }
  0xee   : > { %p3374_p1 = pneg %p3373_p0 }
  0xf0   : > { %p3379_p2 = pnand %p3377_p3, %p3374_p1 }
  0xf2   : > { %3382 = shalt.err (!%p3379_p2)
}
  0xf3   : > { %s3383_s22 = scalar_lea.vmem %s650_s9, 16  ;;  %s3390_s23 = scalar_lea.vmem %s650_s9, 32 }
  0xf4   : > { %p3384_p5 = scmp.ne.s32.totalorder %s650_s9, %s3383_s22  ;;  %p3391_p10 = scmp.lt.s32.totalorder %s650_s9, %s650_s9 }
  0xf5   : > { %p3392_p11 = scmp.lt.s32.totalorder %s3390_s23, %s3383_s22 }
  0xf6   : > { %p3386_p7 = pnand %p3384_p5, %p3775_p8 }
  0xf7   : > { %p3393_p12 = por %p3392_p11, %p3391_p10 }
  0xf8   : > { %p3387_p9 = pneg %p3386_p7 }
  0xfa   : > { %p3394_p4 = pnand %p3393_p12, %p3387_p9 }
  0xfc   : > { %3397 = shalt.err (!%p3394_p4)
}
  0xfd   : > { %3011 = dma.hbm_to_vmem [thread:$0]  (!%p3761_p6), %s4476_s10, 16, %s650_s9, [#allocation12]  }
  0xfe   : > { %s3398_s20 = scalar_lea.hbm %s4417_s14, 16 }
  0xff   : > { %p3399_p13 = scmp.ne.s32.totalorder %s4417_s14, %s3398_s20  ;;  %p3405_p3 = scmp.lt.u32.totalorder %s3398_s20, %s4417_s14 }
 0x101   : > { %p3401_p0 = pnand %p3399_p13, %p3775_p8 }
 0x103   : > { %p3402_p1 = pneg %p3401_p0 }
 0x105   : > { %p3407_p2 = pnand %p3405_p3, %p3402_p1 }
 0x107   : > { %3410 = shalt.err (!%p3407_p2)
}
 0x108   : > { %s3411_s22 = scalar_lea.vmem %s678_s27, 16  ;;  %s3418_s9 = scalar_lea.vmem %s678_s27, 32 }
 0x109   : > { %p3412_p5 = scmp.ne.s32.totalorder %s678_s27, %s3411_s22  ;;  %p3419_p10 = scmp.lt.s32.totalorder %s678_s27, %s678_s27 }
 0x10a   : > { %p3420_p11 = scmp.lt.s32.totalorder %s3418_s9, %s3411_s22 }
 0x10b   : > { %p3414_p7 = pnand %p3412_p5, %p3775_p8 }
 0x10c   : > { %p3421_p12 = por %p3420_p11, %p3419_p10 }
 0x10d   : > { %p3415_p9 = pneg %p3414_p7 }
 0x10f   : > { %p3422_p4 = pnand %p3421_p12, %p3415_p9 }
 0x111   : > { %3425 = shalt.err (!%p3422_p4)
}
 0x112   : > { %3017 = dma.hbm_to_vmem [thread:$0]  (!%p3761_p6), %s4417_s14, 16, %s678_s27, [#allocation15]  }
 0x113   : > { %s3583_s1 = smov [#allocation19]   ;;  %s3426_s18 = scalar_lea.hbm %s4419_s16, 16 }
 0x114   : > { %s699_s5 = sshll.u32 %s3583_s1, 4  ;;  %p3427_p13 = scmp.ne.s32.totalorder %s4419_s16, %s3426_s18  ;;  %s700_s5 = int_to_ptr.vmem [resolvable:$true] %s699_s5 }
 0x115   : > { %p3433_p3 = scmp.lt.u32.totalorder %s3426_s18, %s4419_s16 }
 0x116   : > { %p3429_p0 = pnand %p3427_p13, %p3775_p8 }
 0x118   : > { %p3430_p1 = pneg %p3429_p0 }
 0x11a   : > { %p3435_p2 = pnand %p3433_p3, %p3430_p1 }
 0x11c   : > { %3438 = shalt.err (!%p3435_p2)
}
 0x11d   : > { %s3439_s27 = scalar_lea.vmem %s700_s5, 16  ;;  %s3446_s9 = scalar_lea.vmem %s700_s5, 32 }
 0x11e   : > { %p3440_p5 = scmp.ne.s32.totalorder %s700_s5, %s3439_s27  ;;  %p3447_p10 = scmp.lt.s32.totalorder %s700_s5, %s700_s5 }
 0x11f   : > { %p3448_p11 = scmp.lt.s32.totalorder %s3446_s9, %s3439_s27 }
 0x120   : > { %p3442_p7 = pnand %p3440_p5, %p3775_p8 }
 0x121   : > { %p3449_p12 = por %p3448_p11, %p3447_p10 }
 0x122   : > { %p3443_p9 = pneg %p3442_p7 }
 0x124   : > { %p3450_p4 = pnand %p3449_p12, %p3443_p9 }
 0x126   : > { %3453 = shalt.err (!%p3450_p4)
}
 0x127   : > { %3023 = dma.hbm_to_vmem [thread:$0]  (!%p3761_p6), %s4419_s16, 16, %s700_s5, [#allocation18]  }
 0x128   : > { %s2636_s6 = sadd.s32 4294967294, %s3570_s25   ;;  %s3972_s7 = sadd.s32 1, %s3570_s25  }
 0x129   : > { %s100_s1 = ssub.s32 %s3570_s25, %s3972_s7  ;;  %s103_s29 = sadd.s32 1, %s3566_s24 }
 0x12a   : > { %p101_p8 = scmp.eq.s32.totalorder %s100_s1, 0  ;;  %p110_p13 = scmp.ne.s32.totalorder %s3566_s24, %s3562_s30 }
 0x12b   : > { %p111_p0 = scmp.eq.s32.totalorder %s3570_s25, 0  ;;  %p116_p1 = scmp.ne.s32.totalorder %s3562_s30, %s3558_s4 }
 0x12c   : > { %s3983_s20 = scalar_select %p101_p8, %s3566_s24, %s103_s29  }
 0x12d   : > { %p3985_p3 = por %p111_p0, %p110_p13  ;;  %p4478_p2 = scmp.eq.s32.totalorder %s3743_s26, 0 }
 0x12e   : > { %p560_p5 = scmp.eq.s32.totalorder %s3743_s26, 1  ;;  %p566_p7 = scmp.eq.s32.totalorder %s2636_s6, 1 }
 0x12f   : > { %p3991_p6 = por %p4478_p2, %p116_p1  ;;  %p3042_p9 = scmp.lt.s32.totalorder %s3570_s25, 2 }
 0x130   : > { %s743_s3 = sand.u32 1, %s3566_s24   ;;  %p3998_p10 = por %p560_p5, %p110_p13 }
 0x131   : > { %p4002_p11 = por %p566_p7, %p116_p1  ;;  %s2649_s22 = sshll.u32 %s3570_s25, 4 }
 0x132   : > { %s4480_s0 = scalar_select %p3998_p10, 1, 0 }
 0x133   : > { %s4481_s19 = scalar_select %p4002_p11, 1, 0 }
 0x134   : > { %s746_s27 = scalar_lea.vmem [#allocation2], %s743_s3  ;;  %s4482_s1 = sld [smem:[#allocation30_spill]] }
 0x135   : > { %s753_s9 = sshll.u32 %s746_s27, 4  ;;  %p4016_p12 = pnand %p3042_p9, %p3985_p3  ;;  %s4012_s9 = int_to_ptr.vmem [resolvable:$true] %s753_s9 }
 0x136   : > { %s744_s8 = scalar_lea.sflag [#allocation3], %s743_s3 }
 0x137   : > { %p3456_p8 = pneg %p4016_p12 }
 0x13a   : > { %s4010_s29 = scalar_lea.hbm %s4482_s1, %s2649_s22  ;;  %s3459_s21 = scalar_lea.hbm %s4482_s1, 32 }
 0x13b   : > { %s3454_s27 = scalar_lea.hbm %s4010_s29, 16  ;;  %p3460_p1 = scmp.lt.u32.totalorder %s4010_s29, %s4482_s1 }
 0x13c   : > { %p3455_p4 = scmp.ne.s32.totalorder %s4010_s29, %s3454_s27  ;;  %p3461_p3 = scmp.lt.u32.totalorder %s3459_s21, %s3454_s27 }
 0x13d   : > { %p3463_p5 = scmp.lt.u32.totalorder %s3454_s27, %s4010_s29 }
 0x13e   : > { %p3457_p13 = pnand %p3456_p8, %p3455_p4  ;;  %p3462_p2 = por %p3461_p3, %p3460_p1 }
 0x140   : > { %p3458_p0 = pneg %p3457_p13  ;;  %p3464_p7 = por %p3463_p5, %p3462_p2 }
 0x142   : > { %p3465_p9 = pnand %p3464_p7, %p3458_p0 }
 0x144   : > { %3468 = shalt.err (!%p3465_p9)
}
 0x145   : > { %s3469_s3 = scalar_lea.vmem %s4012_s9, 16  ;;  %s3584_s22 = smov [#allocation2]  }
 0x146   : > { %p3470_p4 = scmp.ne.s32.totalorder %s4012_s9, %s3469_s3  ;;  %s3474_s23 = sshll.u32 %s3584_s22, 4  ;;  %s3475_s23 = int_to_ptr.vmem [resolvable:$false] %s3474_s23 }
 0x147   : > { %s3476_s10 = scalar_lea.vmem %s3475_s23, 32  ;;  %p3477_p10 = scmp.lt.s32.totalorder %s4012_s9, %s3475_s23 }
 0x148   : > { %p3472_p13 = pnand %p3470_p4, %p3456_p8  ;;  %p3478_p1 = scmp.lt.s32.totalorder %s3476_s10, %s3469_s3 }
 0x14a   : > { %p3473_p11 = pneg %p3472_p13  ;;  %p3479_p3 = por %p3478_p1, %p3477_p10 }
 0x14c   : > { %p3480_p2 = pnand %p3479_p3, %p3473_p11 }
 0x14e   : > { %3483 = shalt.err (!%p3480_p2)
}
 0x14f   : > { %3027 = dma.hbm_to_vmem [thread:$0]  (!%p4016_p12), %s4010_s29, 16, %s4012_s9, %s744_s8  }
 0x150   : > { %p4484_p0 = scmp.ne.s32.totalorder %s4467_s2, 0 }
 0x151   : > { %s4048_s27 = sand.u32 (!%p4484_p0), 1, %s3562_s30  }
 0x152   : > { %762 = sbr.rel (%p4484_p0) target bundleno = 4720 (0x1270), region = 112  ;;  %s765_s21 = scalar_lea.sflag (!%p4484_p0), [#allocation3], %s4048_s27 }
 0x159   : > { %3529 = dma.done.wait (%p3991_p6), %s765_s21, 16  }
 0x15a   : > { %3531 = vsyncadd (%p3991_p6), %s765_s21, 4294967280  ;;  %p4485_p10 = scmp.eq.s32.totalorder %s3743_s26, 0 }
 0x15c   : > { %3533 = dma.done.wait (%p4485_p10), [#allocation6], 32   ;;  %p4486_p11 = pmov %p4485_p10 }
 0x15d   : > { %p4487_p12 = pmov %p4485_p10 }
 0x15e   : > { %3535 = vsyncadd (%p4486_p11), [#allocation6], 4294967264 }
 0x15f   : > { %3537 = dma.done.wait (%p4487_p12), [#allocation9], 272   ;;  %p4488_p8 = pmov %p4485_p10 }
 0x161   : > { %3539 = vsyncadd (%p4488_p8), [#allocation9], 4294967024  ;;  %p4489_p5 = pmov %p4488_p8 }
 0x163   : > { %3541 = dma.done.wait (%p4489_p5), [#allocation12], 32   ;;  %p4490_p7 = pmov %p4489_p5 }
 0x164   : > { %p4491_p6 = pmov %p4489_p5 }
 0x165   : > { %3543 = vsyncadd (%p4490_p7), [#allocation12], 4294967264 }
 0x166   : > { %3545 = dma.done.wait (%p4491_p6), [#allocation15], 32   ;;  %p4492_p9 = pmov %p4489_p5 }
 0x167   : > { %p4493_p4 = pmov %p4489_p5 }
 0x168   : > { %3547 = vsyncadd (%p4492_p9), [#allocation15], 4294967264 }
 0x169   : > { %3549 = dma.done.wait (%p4493_p4), [#allocation18], 32   ;;  %p4494_p13 = pmov %p4493_p4 }
 0x16a   : > { %p878_p1 = scmp.lt.s32.totalorder %s3743_s26, 1  ;;  %v3585_v0 = vmov 0.0   ;;  %vm3586_vm0 = vmmov 0   ;;  %s4495_s29 = sld [smem:[#allocation28_spill]]  ;;  %vm916_vm1 = vcmask 261120   ;;  %vm1030_vm2 = vcmask 64512  }
 0x16b   : > { %3551 = vsyncadd (%p4494_p13), [#allocation18], 4294967264  ;;  %2785 = vmatprep.subr.bf16.mxu1 %v3585_v0  ;;  %2789 = vmatprep.mubr.msk.bf16.mxu1 %vm3586_vm0, %v3585_v0  ;;  %s4496_s23 = sld [smem:[#allocation31_spill]]  ;;  %s4497_s9 = sld [smem:[#allocation33_spill]]  ;;  %v2669_v14 = vld [vmem:[#allocation7] ss:$0 sm:$0xff] }
 0x16c   : > { %s879_s8 = scalar_select %p878_p1, %s3743_s26, 1  ;;  %2813 = vmatprep.subr.bf16.mxu0 %v3585_v0  ;;  %2815 = vmatprep.mubr.msk.bf16.mxu0 %vm3586_vm0, %v3585_v0  ;;  %v2665_v17 = vld [vmem:[#allocation5] ss:$0 sm:$0xff]  ;;  %vm1085_vm3 = vcmask 130048   ;;  %vm1490_vm4 = vcmask 195584   ;;  %vm1726_vm5 = vcmask 1043456  }
 0x16d   : > { %s4498_s22 = sld [smem:[#allocation29_spill]]  ;;  %s3589_s10 = smov 104  }
 0x16e   : > { %s2662_s2 = sshll.u32 %s879_s8, 3  ;;  %s2725_s18 = sshll.u32 %s879_s8, 4 }
 0x16f   : > { %s4499_s21 = scalar_lea.vmem [#allocation2], %s4048_s27  ;;  %s3590_s5 = smov 96  }
 0x170   : > { %s881_s6 = scalar_lea.vmem %s4495_s29, %s2662_s2  ;;  %v2674_v36 = vld [vmem:[%s4499_s21] ss:$0 sm:$0xff]  ;;  %s3591_s2 = smov 80  }
 0x171   : > { %v3114_v1 = vld [vmem:[%s4496_s23] sm:$0xff]   ;;  %v3115_v2 = vld [vmem:[%s4496_s23 + $0x8] sm:$0xff]   ;;  %s3592_s29 = smov 72   ;;  %s3593_s3 = smov 88  }
 0x172   : > { %2786 = vmatpush3.bf16.msra.mxu1 %v3114_v1  ;;  %v4093_v3 = vld [vmem:[%s881_s6] sm:$0xff]  ;;  %v3117_v6 = vld [vmem:[%s4497_s9 + $0x8] sm:$0xff]   ;;  %s4442_s8 = smov 16   ;;  %s4441_s6 = smov 24  }
 0x173   : > { %2787 = vmatprep.subr.bf16.mxu1 %v3585_v0  ;;  %v896_v4 = vpack.c.bf16 %v4093_v3, %v4093_v3  ;;  %v3116_v5 = vld [vmem:[%s4497_s9] sm:$0xff]   ;;  %s886_s1 = scalar_lea.vmem %s4498_s22, %s2725_s18  ;;  %s3588_s18 = smov 120  }
 0x174   : > { %v889_v7 = vld [vmem:[%s886_s1] sm:$0xff]  ;;  %v890_v8 = vld [vmem:[%s886_s1 + $0x8] sm:$0xff]  ;;  %s3587_s1 = smov 112   ;;  %s4443_s22 = smov 8  }
 0x175   : > { %v964_v9 = vpack.c.bf16 %v890_v8, %v889_v7  ;;  %s4500_s11 = sld [smem:[#allocation39_spill]]  ;;  %s4502_s13 = sld [smem:[#allocation41_spill]] }
 0x176   : > { %2788 = vmatpush3.bf16.msra.mxu1 %v3115_v2  ;;  %s4504_s21 = smov 24   ;;  %s4511_s12 = sld [smem:[#allocation48_spill]] }
 0x177   : > { %2793 = vmatprep.subr.bf16.mxu1 %v3585_v0  ;;  %p4512_p2 = scmp.ne.s32.totalorder %s4480_s0, 0 }
 0x179   : > { %2790 = vmatmul.mubr.msk.bf16.vlgmr.msra.gmra.mrb[0].mxu1 %vm916_vm1, %v896_v4 }
 0x17a   : > { %2794 = vmatpush3.bf16.msra.mxu1 %v3116_v5  ;;  %2797 = vmatprep.mubr.msk.bf16.mxu1 %vm3586_vm0, %v3585_v0 }
 0x17b   : > { %2795 = vmatprep.subr.bf16.mxu1 %v3585_v0 }
 0x17e   : > { %2796 = vmatpush3.bf16.msra.mxu1 %v3117_v6 }
 0x17f   : > { %2801 = vmatprep.subr.bf16.mxu1 %v3585_v0 }
 0x181   : > { %2798 = vmatmul.mubr.msk.bf16.vlgmr.msra.gmra.mrb[4].mxu1 %vm916_vm1, %v964_v9 }
 0x182   : > { %2803 = vmatprep.mubr.msk.bf16.mxu1 %vm3586_vm0, %v3585_v0 }
 0x24c   : > { %v954_v10 = vpop.f32.mrb[0].mxu1 }
 0x24d   : > { %v2791_v11 = vpop.f32.mrb[1].mxu1  ;;  %v955_v22 = vadd.f32 %v2665_v17, %v954_v10 }
 0x24e   : > { %v957_v12 = vpop.f32.mrb[2].mxu1 }
 0x24f   : > { %v2792_v13 = vpop.f32.mrb[3].mxu1  ;;  %v1028_v25 = vpack.c.bf16 %v955_v22, %v955_v22 }
 0x254   : > { %v1021_v15 = vpop.f32.mrb[4].mxu1 }
 0x255   : > { %v2799_v16 = vpop.f32.mrb[5].mxu1  ;;  %v1022_v19 = vadd.f32 %v2669_v14, %v1021_v15 }
 0x256   : > { %v1024_v18 = vpop.f32.mrb[6].mxu1 }
 0x257   : > { %v1025_v20 = vadd.f32 %v2669_v14, %v1024_v18  ;;  %v2800_v21 = vpop.f32.mrb[7].mxu1 }
 0x259   : > { %v4116_v23 = vpack.c.bf16 %v1025_v20, %v1022_v19 }
 0x25b   : > { %1258 = vrot.lane.b32.xlu1 %v4116_v23, %s3587_s1  ;;  %1148 = vrot.lane.b32.xlu0 %v4116_v23, %s3588_s18  ;;  %v1035_v24 = vsel %vm1030_vm2, %v4116_v23, 0 }
 0x25c   : > { %2802 = vmatpush3.bf16.xpose.msra.mxu1 %v1035_v24 }
 0x25d   : > { %2807 = vmatprep.subr.bf16.mxu1 %v3585_v0 }
 0x25f   : > { %1256 = vrot.lane.b32.xlu1 %v1028_v25, %s3587_s1  ;;  %1146 = vrot.lane.b32.xlu0 %v1028_v25, %s3588_s18 }
 0x263   : > { %1366 = vrot.lane.b32.xlu1 %v1028_v25, %s3589_s10  ;;  %1368 = vrot.lane.b32.xlu0 %v4116_v23, %s3589_s10 }
 0x264   : > { %2804 = vmatmul.mubr.msk.bf16.vlgmr.msra.gmra.mrb[8].mxu1 %vm1030_vm2, %v1028_v25 }
 0x265   : > { %2809 = vmatprep.mubr.msk.bf16.mxu1 %vm3586_vm0, %v3585_v0 }
 0x2cd   : > { %v1149_v26 = vpop.permute.xlu0 %1148  ;;  %v1259_v28 = vpop.permute.xlu1 %1258 }
 0x2ce   : > { %v1154_v27 = vsel %vm1030_vm2, %v1149_v26, 0  ;;  %v1264_v30 = vsel %vm1030_vm2, %v1259_v28, 0 }
 0x2cf   : > { %2814 = vmatpush3.bf16.xpose.msra.mxu0 %v1154_v27 }
 0x2d0   : > { %2825 = vmatprep.subr.bf16.mxu0 %v3585_v0 }
 0x2d1   : > { %v1147_v29 = vpop.permute.xlu0 %1146  ;;  %v1257_v32 = vpop.permute.xlu1 %1256 }
 0x2d5   : > { %v1369_v31 = vpop.permute.xlu0 %1368  ;;  %v1367_v34 = vpop.permute.xlu1 %1366 }
 0x2d6   : > { %2816 = vmatmul.mubr.msk.bf16.vlgmr.msra.gmra.mrb[0].mxu0 %vm1030_vm2, %v1147_v29  ;;  %v1374_v33 = vsel %vm1030_vm2, %v1369_v31, 0 }
 0x2d7   : > { %2826 = vmatpush3.bf16.xpose.msra.mxu0 %v1264_v30  ;;  %2827 = vmatprep.mubr.msk.bf16.mxu0 %vm3586_vm0, %v3585_v0 }
 0x2d8   : > { %2837 = vmatprep.subr.bf16.mxu0 %v3585_v0 }
 0x2de   : > { %2828 = vmatmul.mubr.msk.bf16.vlgmr.msra.gmra.mrb[4].mxu0 %vm1030_vm2, %v1257_v32 }
 0x2df   : > { %2838 = vmatpush3.bf16.xpose.msra.mxu0 %v1374_v33  ;;  %2839 = vmatprep.mubr.msk.bf16.mxu0 %vm3586_vm0, %v3585_v0 }
 0x2e0   : > { %2849 = vmatprep.subr.bf16.mxu0 %v3585_v0 }
 0x2e6   : > { %2840 = vmatmul.mubr.msk.bf16.vlgmr.msra.gmra.mrb[8].mxu0 %vm1030_vm2, %v1367_v34 }
 0x2e7   : > { %2853 = vmatprep.mubr.msk.bf16.mxu0 %vm3586_vm0, %v3585_v0 }
 0x337   : > { %v1071_v35 = vpop.f32.mrb[8].mxu1 }
 0x338   : > { %v1077_v37 = vmul.f32 0.35355338, %v1071_v35  ;;  %v2805_v38 = vpop.f32.mrb[9].mxu1 }
 0x339   : > { %v1074_v39 = vpop.f32.mrb[10].mxu1 }
 0x33a   : > { %v2806_v40 = vpop.f32.mrb[11].mxu1  ;;  %v1084_v41 = vadd.f32 %v2674_v36, %v1077_v37 }
 0x33c   : > { %v1086_v42 = vsel %vm1085_vm3, %v1084_v41, -inf }
 0x33d   : > { %1087 = vmax.xlane.f32.xlu0 %v1086_v42 }
 0x3a9   : > { %v1190_v43 = vpop.f32.mrb[0].mxu0 }
 0x3aa   : > { %v1196_v44 = vmul.f32 0.35355338, %v1190_v43  ;;  %v2817_v45 = vpop.f32.mrb[1].mxu0 }
 0x3ab   : > { %v1193_v46 = vpop.f32.mrb[2].mxu0 }
 0x3ac   : > { %v2818_v47 = vpop.f32.mrb[3].mxu0  ;;  %v1197_v48 = vadd.f32 %v2674_v36, %v1196_v44  ;;  %v3118_v46 = vld [vmem:[#allocation8] sm:$0xff]  }
 0x3ad   : > { %2850 = vmatpush3.bf16.msra.mxu0 %v3118_v46 }
 0x3ae   : > { %v1198_v49 = vsel %vm1085_vm3, %v1197_v48, -inf  ;;  %2851 = vmatprep.subr.bf16.mxu0 %v3585_v0 }
 0x3af   : > { %1199 = vmax.xlane.f32.xlu1 %v1198_v49 }
 0x3b1   : > { %v1300_v50 = vpop.f32.mrb[4].mxu0 }
 0x3b2   : > { %v1306_v51 = vmul.f32 0.35355338, %v1300_v50  ;;  %v2829_v52 = vpop.f32.mrb[5].mxu0 }
 0x3b3   : > { %v1303_v53 = vpop.f32.mrb[6].mxu0 }
 0x3b4   : > { %v2830_v54 = vpop.f32.mrb[7].mxu0  ;;  %v1307_v55 = vadd.f32 %v2674_v36, %v1306_v51  ;;  %v3119_v51 = vld [vmem:[#allocation8 + $0x8] sm:$0xff]  }
 0x3b5   : > { %2852 = vmatpush3.bf16.msra.mxu0 %v3119_v51 }
 0x3b6   : > { %v1308_v56 = vsel %vm1085_vm3, %v1307_v55, -inf  ;;  %2865 = vmatprep.subr.bf16.mxu0 %v3585_v0 }
 0x3b7   : > { %1309 = vmax.xlane.f32.xlu0 %v1308_v56 }
 0x3b9   : > { %v1410_v57 = vpop.f32.mrb[8].mxu0 }
 0x3ba   : > { %v1416_v58 = vmul.f32 0.35355338, %v1410_v57  ;;  %v2841_v59 = vpop.f32.mrb[9].mxu0 }
 0x3bb   : > { %v1413_v60 = vpop.f32.mrb[10].mxu0 }
 0x3bc   : > { %v2842_v61 = vpop.f32.mrb[11].mxu0  ;;  %v1417_v62 = vadd.f32 %v2674_v36, %v1416_v58 }
 0x3be   : > { %v1418_v63 = vsel %vm1085_vm3, %v1417_v62, -inf }
 0x3bf   : > { %1419 = vmax.xlane.f32.xlu0 %v1418_v63 }
 0x3ca   : > { %v1088_v1 = vpop.xlane.xlu0 %1087 }
 0x3cb   : > { %v1089_v2 = vsub.f32 %v1084_v41, %v1088_v1 }
 0x3cd   : > { %v1090_v4 = vmul.f32 1.442695, %v1089_v2 }
 0x3cf   : > { %3134 = vpow2.f32 %v1090_v4 }
 0x3d9   : > { %v3135_v5 = vpop.eup %3134 }
 0x3da   : > { %v1092_v6 = vsel %vm1085_vm3, %v3135_v5, 0.0 }
 0x3db   : > { %1093 = vadd.xlane.f32.xlu1 %v1092_v6  ;;  %v2685_v6 = vld [vmem:[#allocation10] ss:$0 sm:$0xff] }
 0x3ec   : > { %1099 = vrot.lane.b32.xlu1 %v4116_v23, %s3590_s5 }
 0x43c   : > { %v1200_v7 = vpop.xlane.xlu1 %1199 }
 0x43d   : > { %v1201_v8 = vsub.f32 %v1197_v48, %v1200_v7 }
 0x43f   : > { %v1202_v9 = vmul.f32 1.442695, %v1201_v8 }
 0x441   : > { %3136 = vpow2.f32 %v1202_v9 }
 0x444   : > { %v1310_v10 = vpop.xlane.xlu0 %1309 }
 0x445   : > { %v1311_v11 = vsub.f32 %v1307_v55, %v1310_v10 }
 0x447   : > { %v1312_v12 = vmul.f32 1.442695, %v1311_v11 }
 0x449   : > { %3138 = vpow2.f32 %v1312_v12 }
 0x44b   : > { %v3137_v13 = vpop.eup %3136 }
 0x44c   : > { %v1420_v14 = vpop.xlane.xlu0 %1419  ;;  %v1204_v15 = vsel %vm1085_vm3, %v3137_v13, 0.0 }
 0x44d   : > { %v1421_v16 = vsub.f32 %v1417_v62, %v1420_v14  ;;  %1205 = vadd.xlane.f32.xlu0 %v1204_v15 }
 0x44f   : > { %v1422_v17 = vmul.f32 1.442695, %v1421_v16 }
 0x451   : > { %3140 = vpow2.f32 %v1422_v17 }
 0x453   : > { %v3139_v18 = vpop.eup %3138 }
 0x454   : > { %v1314_v19 = vsel %vm1085_vm3, %v3139_v18, 0.0 }
 0x455   : > { %1315 = vadd.xlane.f32.xlu1 %v1314_v19 }
 0x45b   : > { %v3141_v20 = vpop.eup %3140 }
 0x45c   : > { %v1424_v21 = vsel %vm1085_vm3, %v3141_v20, 0.0 }
 0x45d   : > { %1425 = vadd.xlane.f32.xlu0 %v1424_v21 }
 0x466   : > { %1320 = vrot.lane.b32.xlu1 %v4116_v23, %s3591_s2 }
 0x468   : > { %v1094_v22 = vpop.xlane.xlu1 %1093 }
 0x469   : > { %3142 = vrcp.f32 %v1094_v22 }
 0x46a   : > { %1430 = vrot.lane.b32.xlu1 %v4116_v23, %s3592_s29 }
 0x46c   : > { %v1100_v24 = vpop.permute.xlu1 %1099 }
 0x46d   : > { %2808 = vmatpush3.bf16.msra.mxu1 %v1100_v24  ;;  %v2686_v24 = vld [vmem:[#allocation11] ss:$0 sm:$0xff] }
 0x46e   : > { %2819 = vmatprep.subr.bf16.mxu1 %v3585_v0 }
 0x473   : > { %v3143_v25 = vpop.eup %3142  ;;  %1210 = vrot.lane.b32.xlu0 %v4116_v23, %s3593_s3 }
 0x474   : > { %v1096_v26 = vmul.f32 %v3143_v25, %v3135_v5 }
 0x476   : > { %v1097_v27 = vpack.c.bf16 %v1096_v26, %v1096_v26  ;;  %v2687_v26 = vld [vmem:[#allocation13] ss:$0 sm:$0xff] }
 0x478   : > { %2810 = vmatmul.mubr.msk.bf16.vlgmr.msra.gmra.mrb[12].mxu1 %vm1085_vm3, %v1097_v27 }
 0x479   : > { %2821 = vmatprep.mubr.msk.bf16.mxu1 %vm3586_vm0, %v3585_v0 }
 0x4da   : > { %v1206_v28 = vpop.xlane.xlu0 %1205 }
 0x4db   : > { %3144 = vrcp.f32 %v1206_v28 }
 0x4e2   : > { %v1316_v29 = vpop.xlane.xlu1 %1315 }
 0x4e3   : > { %3146 = vrcp.f32 %v1316_v29 }
 0x4e5   : > { %v3145_v30 = vpop.eup %3144 }
 0x4e6   : > { %v1208_v32 = vmul.f32 %v3145_v30, %v3137_v13  ;;  %v1321_v35 = vpop.permute.xlu1 %1320  ;;  %v2688_v30 = vld [vmem:[#allocation14] ss:$0 sm:$0xff] }
 0x4e8   : > { %v1209_v34 = vpack.c.bf16 %v1208_v32, %v1208_v32 }
 0x4ea   : > { %v1426_v31 = vpop.xlane.xlu0 %1425  ;;  %v1431_v39 = vpop.permute.xlu1 %1430 }
 0x4eb   : > { %3148 = vrcp.f32 %v1426_v31 }
 0x4ed   : > { %v3147_v23 = vpop.eup %3146 }
 0x4ee   : > { %v1211_v33 = vpop.permute.xlu0 %1210  ;;  %v1318_v36 = vmul.f32 %v3147_v23, %v3139_v18  ;;  %v3120_v18 = vld [vmem:[%s4500_s11] sm:$0xff]  }
 0x4ef   : > { %2820 = vmatpush3.bf16.msra.mxu1 %v1211_v33 }
 0x4f0   : > { %2831 = vmatprep.subr.bf16.mxu1 %v3585_v0  ;;  %v1319_v37 = vpack.c.bf16 %v1318_v36, %v1318_v36 }
 0x4f2   : > { %2822 = vmatmul.mubr.msk.bf16.vlgmr.msra.gmra.mrb[16].mxu1 %vm1085_vm3, %v1209_v34 }
 0x4f3   : > { %2832 = vmatpush3.bf16.msra.mxu1 %v1321_v35  ;;  %2833 = vmatprep.mubr.msk.bf16.mxu1 %vm3586_vm0, %v3585_v0 }
 0x4f4   : > { %2843 = vmatprep.subr.bf16.mxu1 %v3585_v0 }
 0x4f5   : > { %v3149_v38 = vpop.eup %3148 }
 0x4f6   : > { %v1428_v40 = vmul.f32 %v3149_v38, %v3141_v20 }
 0x4f8   : > { %v1429_v41 = vpack.c.bf16 %v1428_v40, %v1428_v40 }
 0x4fa   : > { %2834 = vmatmul.mubr.msk.bf16.vlgmr.msra.gmra.mrb[20].mxu1 %vm1085_vm3, %v1319_v37 }
 0x4fb   : > { %2844 = vmatpush3.bf16.msra.mxu1 %v1431_v39  ;;  %2845 = vmatprep.mubr.msk.bf16.mxu1 %vm3586_vm0, %v3585_v0 }
 0x4fc   : > { %2857 = vmatprep.subr.bf16.mxu1 %v3585_v0 }
 0x502   : > { %2846 = vmatmul.mubr.msk.bf16.vlgmr.msra.gmra.mrb[24].mxu1 %vm1085_vm3, %v1429_v41 }
 0x503   : > { %2861 = vmatprep.mubr.msk.bf16.mxu1 %vm3586_vm0, %v3585_v0  ;;  %2858 = vmatpush3.bf16.msra.mxu1 %v3120_v18 }
 0x504   : > { %2859 = vmatprep.subr.bf16.mxu1 %v3585_v0 }
 0x54b   : > { %v1139_v42 = vpop.f32.mrb[12].mxu1 }
 0x54c   : > { %v2811_v43 = vpop.f32.mrb[13].mxu1 }
 0x54d   : > { %v1142_v44 = vpop.f32.mrb[14].mxu1 }
 0x54e   : > { %v2812_v45 = vpop.f32.mrb[15].mxu1 }
 0x5c5   : > { %v1250_v47 = vpop.f32.mrb[16].mxu1 }
 0x5c6   : > { %1477 = vrot.lane.b32.xlu0 %v1250_v47, %s4443_s22  ;;  %v2823_v48 = vpop.f32.mrb[17].mxu1  ;;  %s4506_s22 = sld [smem:[#allocation44_spill]] }
 0x5c7   : > { %v1253_v49 = vpop.f32.mrb[18].mxu1 }
 0x5c8   : > { %v2824_v50 = vpop.f32.mrb[19].mxu1 }
 0x5cd   : > { %v1360_v52 = vpop.f32.mrb[20].mxu1 }
 0x5ce   : > { %1481 = vrot.lane.b32.xlu1 %v1360_v52, %s4442_s8  ;;  %v2835_v53 = vpop.f32.mrb[21].mxu1  ;;  %s2722_s8 = sshll.u32 %s3743_s26, 7  ;;  %s3601_s26 = smov [#allocation20]  }
 0x5cf   : > { %v1363_v54 = vpop.f32.mrb[22].mxu1 }
 0x5d0   : > { %v2836_v55 = vpop.f32.mrb[23].mxu1 }
 0x5d5   : > { %v1470_v56 = vpop.f32.mrb[24].mxu1 }
 0x5d6   : > { %1485 = vrot.lane.b32.xlu0 %v1470_v56, %s4441_s6  ;;  %v2847_v57 = vpop.f32.mrb[25].mxu1  ;;  %s4503_s6 = smov 16  }
 0x5d7   : > { %v1473_v58 = vpop.f32.mrb[26].mxu1 }
 0x5d8   : > { %v2848_v59 = vpop.f32.mrb[27].mxu1 }
 0x638   : > { %v1478_v60 = vpop.permute.xlu0 %1477 }
 0x639   : > { %v1488_v62 = vsel %vm1030_vm2, %v1139_v42, %v1478_v60 }
 0x640   : > { %v1482_v61 = vpop.permute.xlu1 %1481 }
 0x641   : > { %v1489_v63 = vsel %vm1085_vm3, %v1488_v62, %v1482_v61 }
 0x648   : > { %v1486_v1 = vpop.permute.xlu0 %1485 }
 0x649   : > { %v1491_v2 = vsel %vm1490_vm4, %v1489_v63, %v1486_v1 }
 0x64a   : > { %v1496_v4 = vpack.c.bf16 %v1491_v2, %v1491_v2 }
 0x64c   : > { %2854 = vmatmul.mubr.msk.bf16.vlgmr.msra.gmra.mrb[12].mxu0 %vm916_vm1, %v1496_v4 }
 0x64d   : > { %2867 = vmatprep.mubr.msk.bf16.mxu0 %vm3586_vm0, %v3585_v0 }
 0x71f   : > { %v1546_v5 = vpop.f32.mrb[12].mxu0 }
 0x720   : > { %v1552_v7 = vadd.f32 %v1546_v5, %v4093_v3  ;;  %v2855_v8 = vpop.f32.mrb[13].mxu0  ;;  %v3121_v3 = vld [vmem:[%s4500_s11 + $0x8] sm:$0xff]  }
 0x721   : > { %v1549_v9 = vpop.f32.mrb[14].mxu0  ;;  %2860 = vmatpush3.bf16.msra.mxu1 %v3121_v3 }
 0x722   : > { %v2856_v10 = vpop.f32.mrb[15].mxu0  ;;  %v1560_v11 = vadd.f32 %v2685_v6, %v1552_v7  ;;  %2871 = vmatprep.subr.bf16.mxu1 %v3585_v0 }
 0x724   : > { %v1563_v12 = vsel %vm916_vm1, %v1560_v11, 0.0 }
 0x725   : > { %1564 = vadd.xlane.f32.xlu1 %v1563_v12 }
 0x7b2   : > { %v1565_v13 = vpop.xlane.xlu1 %1564 }
 0x7b3   : > { %v1567_v14 = vmul.f32 0.03125, %v1565_v13 }
 0x7b5   : > { %v1568_v15 = vsub.f32 %v1560_v11, %v1567_v14 }
 0x7b7   : > { %v1569_v16 = vmul.f32 %v1568_v15, %v1568_v15 }
 0x7b9   : > { %v1570_v17 = vsel %vm916_vm1, %v1569_v16, 0.0 }
 0x7ba   : > { %1571 = vadd.xlane.f32.xlu0 %v1570_v17 }
 0x847   : > { %v1572_v19 = vpop.xlane.xlu0 %1571 }
 0x848   : > { %v1573_v20 = vmul.f32 0.03125, %v1572_v19 }
 0x84a   : > { %v1574_v21 = vadd.f32 1e-05, %v1573_v20 }
 0x84c   : > { %3150 = vrsqrt.f32 %v1574_v21 }
 0x856   : > { %v3151_v22 = vpop.eup %3150 }
 0x857   : > { %v1576_v25 = vmul.f32 %v3151_v22, %v1568_v15 }
 0x859   : > { %v1583_v27 = vmul.f32 %v2686_v24, %v1576_v25 }
 0x85b   : > { %v4204_v28 = vadd.f32 %v2687_v26, %v1583_v27 }
 0x85d   : > { %v1595_v29 = vpack.c.bf16 %v4204_v28, %v4204_v28 }
 0x85f   : > { %2862 = vmatmul.mubr.msk.bf16.vlgmr.msra.gmra.mrb[28].mxu1 %vm916_vm1, %v1595_v29 }
 0x860   : > { %2873 = vmatprep.mubr.msk.bf16.mxu1 %vm3586_vm0, %v3585_v0 }
 0x932   : > { %v1652_v31 = vpop.f32.mrb[28].mxu1 }
 0x933   : > { %v1653_v32 = vadd.f32 %v2688_v30, %v1652_v31  ;;  %v2863_v33 = vpop.f32.mrb[29].mxu1 }
 0x934   : > { %v1655_v34 = vpop.f32.mrb[30].mxu1 }
 0x935   : > { %v4211_v23 = vpack.c.bf16 %v1653_v32, %v1653_v32  ;;  %v2864_v35 = vpop.f32.mrb[31].mxu1 }
 0x937   : > { %1772 = vrot.lane.b32.xlu1 %v4211_v23, %s3593_s3  ;;  %1660 = vrot.lane.b32.xlu0 %v4211_v23, %s3590_s5  ;;  %s3600_s5 = smov 40   ;;  %s4510_s3 = sld [smem:[#allocation47_spill]] }
 0x93b   : > { %1770 = vrot.lane.b32.xlu1 %v4211_v23, %s3588_s18  ;;  %1883 = vrot.lane.b32.xlu0 %v4211_v23, %s3591_s2  ;;  %s3598_s18 = smov 56   ;;  %s4501_s2 = smov 8  }
 0x93f   : > { %1881 = vrot.lane.b32.xlu1 %v4211_v23, %s3587_s1  ;;  %1994 = vrot.lane.b32.xlu0 %v4211_v23, %s3592_s29  ;;  %s3597_s1 = smov 64   ;;  %s4507_s29 = sld [smem:[#allocation43_spill]] }
 0x943   : > { %1992 = vrot.lane.b32.xlu1 %v4211_v23, %s3589_s10  ;;  %s3599_s10 = smov 48  }
 0x9a9   : > { %v1661_v36 = vpop.permute.xlu0 %1660  ;;  %v1773_v38 = vpop.permute.xlu1 %1772 }
 0x9aa   : > { %v1666_v37 = vsel %vm1030_vm2, %v1661_v36, 0  ;;  %v1778_v39 = vsel %vm1030_vm2, %v1773_v38, 0 }
 0x9ab   : > { %2866 = vmatpush3.bf16.xpose.msra.mxu0 %v1666_v37 }
 0x9ac   : > { %2877 = vmatprep.subr.bf16.mxu0 %v3585_v0 }
 0x9ad   : > { %v1884_v40 = vpop.permute.xlu0 %1883  ;;  %v1771_v41 = vpop.permute.xlu1 %1770 }
 0x9ae   : > { %v1889_v42 = vsel %vm1030_vm2, %v1884_v40, 0 }
 0x9b1   : > { %v1995_v43 = vpop.permute.xlu0 %1994  ;;  %v1882_v44 = vpop.permute.xlu1 %1881 }
 0x9b2   : > { %2868 = vmatmul.mubr.msk.bf16.vlgmr.msra.gmra.mrb[16].mxu0 %vm1030_vm2, %v4211_v23  ;;  %v2000_v45 = vsel %vm1030_vm2, %v1995_v43, 0 }
 0x9b3   : > { %2878 = vmatpush3.bf16.xpose.msra.mxu0 %v1778_v39  ;;  %2879 = vmatprep.mubr.msk.bf16.mxu0 %vm3586_vm0, %v3585_v0 }
 0x9b4   : > { %2889 = vmatprep.subr.bf16.mxu0 %v3585_v0 }
 0x9b5   : > { %v1993_v46 = vpop.permute.xlu1 %1992 }
 0x9ba   : > { %2880 = vmatmul.mubr.msk.bf16.vlgmr.msra.gmra.mrb[20].mxu0 %vm1030_vm2, %v1771_v41 }
 0x9bb   : > { %2890 = vmatpush3.bf16.xpose.msra.mxu0 %v1889_v42  ;;  %2891 = vmatprep.mubr.msk.bf16.mxu0 %vm3586_vm0, %v3585_v0 }
 0x9bc   : > { %2901 = vmatprep.subr.bf16.mxu0 %v3585_v0 }
 0x9c2   : > { %2892 = vmatmul.mubr.msk.bf16.vlgmr.msra.gmra.mrb[24].mxu0 %vm1030_vm2, %v1882_v44 }
 0x9c3   : > { %2902 = vmatpush3.bf16.xpose.msra.mxu0 %v2000_v45  ;;  %2903 = vmatprep.mubr.msk.bf16.mxu0 %vm3586_vm0, %v3585_v0 }
 0x9c4   : > { %2913 = vmatprep.subr.bf16.mxu0 %v3585_v0 }
 0x9ca   : > { %2904 = vmatmul.mubr.msk.bf16.vlgmr.msra.gmra.mrb[28].mxu0 %vm1030_vm2, %v1993_v46 }
 0x9cb   : > { %2917 = vmatprep.mubr.msk.bf16.mxu0 %vm3586_vm0, %v3585_v0 }
 0xa85   : > { %v1702_v47 = vpop.f32.mrb[16].mxu0 }
 0xa86   : > { %v1708_v48 = vmul.f32 0.35355338, %v1702_v47  ;;  %v2869_v49 = vpop.f32.mrb[17].mxu0 }
 0xa87   : > { %v1705_v50 = vpop.f32.mrb[18].mxu0 }
 0xa88   : > { %v2870_v51 = vpop.f32.mrb[19].mxu0  ;;  %v1709_v52 = vsel %vm1030_vm2, %v1708_v48, -inf }
 0xa89   : > { %1710 = vmax.xlane.f32.xlu0 %v1709_v52 }
 0xa8d   : > { %v1814_v53 = vpop.f32.mrb[20].mxu0 }
 0xa8e   : > { %v1820_v54 = vmul.f32 0.35355338, %v1814_v53  ;;  %v2881_v55 = vpop.f32.mrb[21].mxu0 }
 0xa8f   : > { %v1817_v56 = vpop.f32.mrb[22].mxu0 }
 0xa90   : > { %v2882_v57 = vpop.f32.mrb[23].mxu0  ;;  %v1821_v58 = vsel %vm1030_vm2, %v1820_v54, -inf }
 0xa91   : > { %1822 = vmax.xlane.f32.xlu1 %v1821_v58 }
 0xa95   : > { %v1925_v59 = vpop.f32.mrb[24].mxu0 }
 0xa96   : > { %v1931_v60 = vmul.f32 0.35355338, %v1925_v59  ;;  %v2893_v61 = vpop.f32.mrb[25].mxu0 }
 0xa97   : > { %v1928_v62 = vpop.f32.mrb[26].mxu0  ;;  %v3122_v61 = vld [vmem:[%s4502_s13] sm:$0xff]  }
 0xa98   : > { %v2894_v63 = vpop.f32.mrb[27].mxu0  ;;  %v1932_v1 = vsel %vm1030_vm2, %v1931_v60, -inf  ;;  %2914 = vmatpush3.bf16.msra.mxu0 %v3122_v61  ;;  %v3123_v62 = vld [vmem:[%s4502_s13 + $0x8] sm:$0xff]   ;;  %s4358_s13 = scalar_lea.hbm %s4511_s12, %s2722_s8 }
 0xa99   : > { %1933 = vmax.xlane.f32.xlu0 %v1932_v1  ;;  %2915 = vmatprep.subr.bf16.mxu0 %v3585_v0 }
 0xa9c   : > { %2916 = vmatpush3.bf16.msra.mxu0 %v3123_v62 }
 0xa9d   : > { %v2036_v2 = vpop.f32.mrb[28].mxu0  ;;  %2929 = vmatprep.subr.bf16.mxu0 %v3585_v0 }
 0xa9e   : > { %v2042_v4 = vmul.f32 0.35355338, %v2036_v2  ;;  %v2905_v5 = vpop.f32.mrb[29].mxu0 }
 0xa9f   : > { %v2039_v6 = vpop.f32.mrb[30].mxu0 }
 0xaa0   : > { %v2906_v7 = vpop.f32.mrb[31].mxu0  ;;  %v2043_v8 = vsel %vm1030_vm2, %v2042_v4, -inf }
 0xaa1   : > { %2044 = vmax.xlane.f32.xlu0 %v2043_v8 }
 0xb16   : > { %v1711_v9 = vpop.xlane.xlu0 %1710 }
 0xb17   : > { %v1712_v10 = vsub.f32 %v1708_v48, %v1711_v9 }
 0xb19   : > { %v1713_v11 = vmul.f32 1.442695, %v1712_v10 }
 0xb1b   : > { %3152 = vpow2.f32 %v1713_v11 }
 0xb1e   : > { %v1823_v12 = vpop.xlane.xlu1 %1822 }
 0xb1f   : > { %v1824_v13 = vsub.f32 %v1820_v54, %v1823_v12 }
 0xb21   : > { %v1825_v14 = vmul.f32 1.442695, %v1824_v13 }
 0xb23   : > { %3154 = vpow2.f32 %v1825_v14 }
 0xb25   : > { %v3153_v15 = vpop.eup %3152 }
 0xb26   : > { %v1715_v16 = vsel %vm1030_vm2, %v3153_v15, 0.0  ;;  %v1934_v17 = vpop.xlane.xlu0 %1933 }
 0xb27   : > { %1716 = vadd.xlane.f32.xlu1 %v1715_v16  ;;  %v1935_v25 = vsub.f32 %v1931_v60, %v1934_v17  ;;  %v2703_v17 = vld [vmem:[#allocation16] ss:$0 sm:$0xff] }
 0xb29   : > { %v1936_v26 = vmul.f32 1.442695, %v1935_v25 }
 0xb2d   : > { %v3155_v18 = vpop.eup %3154 }
 0xb2e   : > { %v2045_v3 = vpop.xlane.xlu0 %2044  ;;  %v1827_v19 = vsel %vm1030_vm2, %v3155_v18, 0.0 }
 0xb2f   : > { %v2046_v20 = vsub.f32 %v2042_v4, %v2045_v3  ;;  %1828 = vadd.xlane.f32.xlu0 %v1827_v19 }
 0xb31   : > { %v2047_v21 = vmul.f32 1.442695, %v2046_v20 }
 0xb33   : > { %3156 = vpow2.f32 %v2047_v21 }
 0xb34   : > { %3158 = vpow2.f32 %v1936_v26 }
 0xb38   : > { %1721 = vrot.lane.b32.xlu1 %v4211_v23, %s3597_s1  ;;  %s2437_s1 = scalar_lea.sflag [#allocation4], %s4048_s27 }
 0xb3d   : > { %v3157_v22 = vpop.eup %3156 }
 0xb3e   : > { %v2049_v24 = vsel %vm1030_vm2, %v3157_v22, 0.0  ;;  %v3159_v27 = vpop.eup %3158 }
 0xb3f   : > { %2050 = vadd.xlane.f32.xlu0 %v2049_v24  ;;  %v1938_v29 = vsel %vm1030_vm2, %v3159_v27, 0.0 }
 0xb55   : > { %1833 = vrot.lane.b32.xlu0 %v4211_v23, %s3598_s18 }
 0xb5c   : > { %1939 = vadd.xlane.f32.xlu1 %v1938_v29 }
 0xb6d   : > { %1944 = vrot.lane.b32.xlu1 %v4211_v23, %s3599_s10  ;;  %s4505_s10 = sld [smem:[#allocation42_spill]] }
 0xb71   : > { %2055 = vrot.lane.b32.xlu1 %v4211_v23, %s3600_s5  ;;  %s4509_s5 = sld [smem:[#allocation46_spill]] }
 0xbb4   : > { %v1717_v30 = vpop.xlane.xlu1 %1716 }
 0xbb5   : > { %3160 = vrcp.f32 %v1717_v30  ;;  %v3124_v30 = vld [vmem:[%s4505_s10] sm:$0xff]  }
 0xbb8   : > { %v1722_v31 = vpop.permute.xlu1 %1721 }
 0xbb9   : > { %v1728_v32 = vsel %vm1726_vm5, %v1722_v31, 0 }
 0xbba   : > { %2872 = vmatpush3.bf16.msra.mxu1 %v1728_v32 }
 0xbbb   : > { %2883 = vmatprep.subr.bf16.mxu1 %v3585_v0 }
 0xbbc   : > { %v1829_v34 = vpop.xlane.xlu0 %1828 }
 0xbbd   : > { %3162 = vrcp.f32 %v1829_v34 }
 0xbbf   : > { %v3161_v33 = vpop.eup %3160 }
 0xbc0   : > { %v1719_v35 = vmul.f32 %v3161_v33, %v3153_v15 }
 0xbc2   : > { %v1720_v36 = vpack.c.bf16 %v1719_v35, %v1719_v35  ;;  %v2704_v35 = vld [vmem:[#allocation17] ss:$0 sm:$0xff] }
 0xbc4   : > { %2874 = vmatmul.mubr.msk.bf16.vlgmr.msra.gmra.mrb[32].mxu1 %vm1030_vm2, %v1720_v36 }
 0xbc5   : > { %2885 = vmatprep.mubr.msk.bf16.mxu1 %vm3586_vm0, %v3585_v0 }
 0xbc7   : > { %v3163_v23 = vpop.eup %3162 }
 0xbc8   : > { %v1831_v38 = vmul.f32 %v3163_v23, %v3155_v18  ;;  %v2705_v23 = vld [vmem:[#allocation19] ss:$0 sm:$0xff] }
 0xbca   : > { %v1832_v41 = vpack.c.bf16 %v1831_v38, %v1831_v38 }
 0xbcc   : > { %v2051_v37 = vpop.xlane.xlu0 %2050 }
 0xbd0   : > { %v1834_v39 = vpop.permute.xlu0 %1833 }
 0xbd1   : > { %v1839_v40 = vsel %vm1726_vm5, %v1834_v39, 0 }
 0xbd2   : > { %2884 = vmatpush3.bf16.msra.mxu1 %v1839_v40  ;;  %v3126_v40 = vld [vmem:[%s4506_s22] sm:$0xff]  }
 0xbd3   : > { %2895 = vmatprep.subr.bf16.mxu1 %v3585_v0 }
 0xbd5   : > { %2886 = vmatmul.mubr.msk.bf16.vlgmr.msra.gmra.mrb[36].mxu1 %vm1030_vm2, %v1832_v41  ;;  %v3127_v41 = vld [vmem:[%s4506_s22 + $0x8] sm:$0xff]  }
 0xbd6   : > { %2897 = vmatprep.mubr.msk.bf16.mxu1 %vm3586_vm0, %v3585_v0 }
 0xbe9   : > { %v1940_v42 = vpop.xlane.xlu1 %1939 }
 0xbea   : > { %3164 = vrcp.f32 %v1940_v42  ;;  %v3128_v42 = vld [vmem:[%s4506_s22 + $0x10] sm:$0xff]  }
 0xbeb   : > { %3166 = vrcp.f32 %v2051_v37 }
 0xbed   : > { %v1945_v43 = vpop.permute.xlu1 %1944 }
 0xbee   : > { %v1950_v44 = vsel %vm1726_vm5, %v1945_v43, 0  ;;  %v3129_v43 = vld [vmem:[%s4506_s22 + $0x18] sm:$0xff]  }
 0xbef   : > { %2896 = vmatpush3.bf16.msra.mxu1 %v1950_v44  ;;  %v3130_v44 = vld [vmem:[%s4506_s22 + $0x20] sm:$0xff]  }
 0xbf0   : > { %2907 = vmatprep.subr.bf16.mxu1 %v3585_v0 }
 0xbf1   : > { %v2056_v47 = vpop.permute.xlu1 %2055 }
 0xbf2   : > { %v2061_v50 = vsel %vm1726_vm5, %v2056_v47, 0  ;;  %v3133_v47 = vld [vmem:[%s4506_s22 + $0x38] sm:$0xff]  }
 0xbf4   : > { %v3165_v45 = vpop.eup %3164 }
 0xbf5   : > { %v1942_v46 = vmul.f32 %v3165_v45, %v3159_v27  ;;  %v3167_v49 = vpop.eup %3166  ;;  %v3131_v45 = vld [vmem:[%s4506_s22 + $0x28] sm:$0xff]  }
 0xbf6   : > { %v2053_v51 = vmul.f32 %v3167_v49, %v3157_v22 }
 0xbf7   : > { %v1943_v48 = vpack.c.bf16 %v1942_v46, %v1942_v46  ;;  %v3132_v46 = vld [vmem:[%s4506_s22 + $0x30] sm:$0xff]  }
 0xbf8   : > { %v2054_v52 = vpack.c.bf16 %v2053_v51, %v2053_v51 }
 0xbf9   : > { %2898 = vmatmul.mubr.msk.bf16.vlgmr.msra.gmra.mrb[40].mxu1 %vm1030_vm2, %v1943_v48  ;;  %v2706_v48 = vld [vmem:[%s4507_s29] ss:$0 sm:$0xff] }
 0xbfa   : > { %2908 = vmatpush3.bf16.msra.mxu1 %v2061_v50  ;;  %2909 = vmatprep.mubr.msk.bf16.mxu1 %vm3586_vm0, %v3585_v0 }
 0xbfb   : > { %2921 = vmatprep.subr.bf16.mxu1 %v3585_v0 }
 0xc01   : > { %2910 = vmatmul.mubr.msk.bf16.vlgmr.msra.gmra.mrb[44].mxu1 %vm1030_vm2, %v2054_v52 }
 0xc02   : > { %2925 = vmatprep.mubr.msk.bf16.mxu1 %vm3586_vm0, %v3585_v0  ;;  %2922 = vmatpush3.bf16.msra.mxu1 %v3124_v30 }
 0xc03   : > { %2923 = vmatprep.subr.bf16.mxu1 %v3585_v0 }
 0xc97   : > { %v1764_v53 = vpop.f32.mrb[32].mxu1 }
 0xc98   : > { %v2875_v54 = vpop.f32.mrb[33].mxu1 }
 0xc99   : > { %v1767_v55 = vpop.f32.mrb[34].mxu1 }
 0xc9a   : > { %v2876_v56 = vpop.f32.mrb[35].mxu1 }
 0xca8   : > { %v1875_v57 = vpop.f32.mrb[36].mxu1 }
 0xca9   : > { %2104 = vrot.lane.b32.xlu0 %v1875_v57, %s4501_s2  ;;  %v2887_v58 = vpop.f32.mrb[37].mxu1 }
 0xcaa   : > { %v1878_v59 = vpop.f32.mrb[38].mxu1 }
 0xcab   : > { %v2888_v60 = vpop.f32.mrb[39].mxu1 }
 0xccc   : > { %v1986_v63 = vpop.f32.mrb[40].mxu1 }
 0xccd   : > { %2108 = vrot.lane.b32.xlu1 %v1986_v63, %s4503_s6  ;;  %v2899_v1 = vpop.f32.mrb[41].mxu1  ;;  %s4508_s6 = sld [smem:[#allocation45_spill]] }
 0xcce   : > { %v1989_v2 = vpop.f32.mrb[42].mxu1 }
 0xccf   : > { %v2900_v4 = vpop.f32.mrb[43].mxu1 }
 0xcd3   : > { %v2718_v1 = vld [vmem:[%s4508_s6] ss:$0 sm:$0xff] }
 0xcd4   : > { %v2097_v5 = vpop.f32.mrb[44].mxu1 }
 0xcd5   : > { %2112 = vrot.lane.b32.xlu0 %v2097_v5, %s4504_s21  ;;  %v2911_v6 = vpop.f32.mrb[45].mxu1  ;;  %s2661_s21 = sshll.u32 %s4048_s27, 3 }
 0xcd6   : > { %v2100_v7 = vpop.f32.mrb[46].mxu1  ;;  %s877_s6 = scalar_lea.vmem [#allocation20], %s2661_s21  ;;  %s3488_s21 = sshll.u32 %s3601_s26, 4  ;;  %s3489_s21 = int_to_ptr.vmem [resolvable:$false] %s3488_s21 }
 0xcd7   : > { %v2912_v8 = vpop.f32.mrb[47].mxu1  ;;  %s2450_s9 = sshll.u32 %s877_s6, 4  ;;  %s4360_s9 = int_to_ptr.vmem [resolvable:$true] %s2450_s9 }
 0xcd8   : > { %s3484_s18 = scalar_lea.vmem %s4360_s9, 128  ;;  %p3491_p11 = scmp.lt.s32.totalorder %s4360_s9, %s3489_s21 }
 0xcd9   : > { %p3485_p3 = scmp.ne.s32.totalorder %s4360_s9, %s3484_s18 }
 0xcdb   : > { %p3486_p0 = pnand %p3485_p3, %p4512_p2 }
 0xcdd   : > { %p3487_p10 = pneg %p3486_p0 }
 0xd1b   : > { %v2105_v9 = vpop.permute.xlu0 %2104 }
 0xd1c   : > { %v2115_v11 = vsel %vm1030_vm2, %v1764_v53, %v2105_v9 }
 0xd3f   : > { %v2109_v10 = vpop.permute.xlu1 %2108 }
 0xd40   : > { %v2116_v12 = vsel %vm1085_vm3, %v2115_v11, %v2109_v10 }
 0xd47   : > { %v2113_v13 = vpop.permute.xlu0 %2112 }
 0xd48   : > { %v2117_v14 = vsel %vm1490_vm4, %v2116_v12, %v2113_v13 }
 0xd49   : > { %v2122_v15 = vpack.c.bf16 %v2117_v14, %v2117_v14 }
 0xd4b   : > { %2918 = vmatmul.mubr.msk.bf16.vlgmr.msra.gmra.mrb[32].mxu0 %vm916_vm1, %v2122_v15 }
 0xd4c   : > { %2945 = vmatprep.mubr.msk.bf16.mxu0 %vm3586_vm0, %v3585_v0  ;;  %2930 = vmatpush3.bf16.msra.mxu0 %v3126_v40 }
 0xd4d   : > { %2931 = vmatprep.subr.bf16.mxu0 %v3585_v0 }
 0xd50   : > { %2932 = vmatpush3.bf16.msra.mxu0 %v3127_v41 }
 0xd51   : > { %2933 = vmatprep.subr.bf16.mxu0 %v3585_v0 }
 0xd54   : > { %2934 = vmatpush3.bf16.msra.mxu0 %v3128_v42 }
 0xd55   : > { %2935 = vmatprep.subr.bf16.mxu0 %v3585_v0 }
 0xd58   : > { %2936 = vmatpush3.bf16.msra.mxu0 %v3129_v43 }
 0xd59   : > { %2937 = vmatprep.subr.bf16.mxu0 %v3585_v0 }
 0xd5c   : > { %2938 = vmatpush3.bf16.msra.mxu0 %v3130_v44 }
 0xd5d   : > { %2939 = vmatprep.subr.bf16.mxu0 %v3585_v0 }
 0xd60   : > { %2940 = vmatpush3.bf16.msra.mxu0 %v3131_v45 }
 0xd61   : > { %2941 = vmatprep.subr.bf16.mxu0 %v3585_v0 }
 0xd64   : > { %2942 = vmatpush3.bf16.msra.mxu0 %v3132_v46 }
 0xd65   : > { %2943 = vmatprep.subr.bf16.mxu0 %v3585_v0 }
 0xd68   : > { %2944 = vmatpush3.bf16.msra.mxu0 %v3133_v47 }
 0xe1e   : > { %v2172_v16 = vpop.f32.mrb[32].mxu0 }
 0xe1f   : > { %v2178_v18 = vadd.f32 %v2172_v16, %v4204_v28  ;;  %v2919_v3 = vpop.f32.mrb[33].mxu0  ;;  %v3125_v28 = vld [vmem:[%s4505_s10 + $0x8] sm:$0xff]  }
 0xe20   : > { %v2175_v19 = vpop.f32.mrb[34].mxu0  ;;  %2924 = vmatpush3.bf16.msra.mxu1 %v3125_v28 }
 0xe21   : > { %v2920_v20 = vpop.f32.mrb[35].mxu0  ;;  %v2186_v21 = vadd.f32 %v2703_v17, %v2178_v18  ;;  %v2719_v18 = vld [vmem:[%s4509_s5] ss:$0 sm:$0xff]  ;;  %s3490_s5 = scalar_lea.vmem %s3489_s21, 256 }
 0xe22   : > { %v2720_v19 = vld [vmem:[%s4510_s3] ss:$0 sm:$0xff]  ;;  %p3492_p12 = scmp.lt.s32.totalorder %s3490_s5, %s3484_s18 }
 0xe23   : > { %v2189_v22 = vsel %vm916_vm1, %v2186_v21, 0.0 }
 0xe24   : > { %2190 = vadd.xlane.f32.xlu1 %v2189_v22  ;;  %p3493_p8 = por %p3492_p12, %p3491_p11 }
 0xe26   : > { %p3494_p5 = pnand %p3493_p8, %p3487_p10 }
 0xeb1   : > { %v2191_v24 = vpop.xlane.xlu1 %2190 }
 0xeb2   : > { %v2192_v25 = vmul.f32 0.03125, %v2191_v24 }
 0xeb4   : > { %v2193_v26 = vsub.f32 %v2186_v21, %v2192_v25 }
 0xeb6   : > { %v2194_v27 = vmul.f32 %v2193_v26, %v2193_v26 }
 0xeb8   : > { %v2195_v29 = vsel %vm916_vm1, %v2194_v27, 0.0 }
 0xeb9   : > { %2196 = vadd.xlane.f32.xlu0 %v2195_v29 }
 0xf46   : > { %v2197_v31 = vpop.xlane.xlu0 %2196 }
 0xf47   : > { %v2198_v32 = vmul.f32 0.03125, %v2197_v31 }
 0xf49   : > { %v2199_v33 = vadd.f32 1e-05, %v2198_v32 }
 0xf4b   : > { %3168 = vrsqrt.f32 %v2199_v33 }
 0xf55   : > { %v3169_v34 = vpop.eup %3168 }
 0xf56   : > { %v2201_v36 = vmul.f32 %v3169_v34, %v2193_v26 }
 0xf58   : > { %v2208_v37 = vmul.f32 %v2704_v35, %v2201_v36 }
 0xf5a   : > { %v2215_v38 = vadd.f32 %v2705_v23, %v2208_v37 }
 0xf5c   : > { %v2220_v39 = vpack.c.bf16 %v2215_v38, %v2215_v38 }
 0xf5e   : > { %2926 = vmatmul.mubr.msk.bf16.vlgmr.msra.gmra.mrb[48].mxu1 %vm916_vm1, %v2220_v39 }
0x1031   : > { %v2277_v49 = vpop.f32.mrb[48].mxu1 }
0x1032   : > { %v2278_v50 = vadd.f32 %v2706_v48, %v2277_v49  ;;  %v2927_v51 = vpop.f32.mrb[49].mxu1 }
0x1033   : > { %v2280_v52 = vpop.f32.mrb[50].mxu1 }
0x1034   : > { %v2283_v53 = vmul.f32 %v2278_v50, %v2278_v50  ;;  %v2928_v54 = vpop.f32.mrb[51].mxu1 }
0x1036   : > { %v2284_v55 = vmul.f32 %v2283_v53, %v2278_v50 }
0x1038   : > { %v2285_v56 = vmul.f32 0.044715, %v2284_v55 }
0x103a   : > { %v2286_v57 = vadd.f32 %v2285_v56, %v2278_v50 }
0x103c   : > { %v2287_v58 = vmul.f32 0.7978846, %v2286_v57 }
0x103e   : > { %3170 = vtanh.f32 %v2287_v58 }
0x1048   : > { %v3171_v59 = vpop.eup %3170 }
0x1049   : > { %v2289_v60 = vadd.f32 1.0, %v3171_v59 }
0x104b   : > { %v2290_v61 = vmul.f32 0.5, %v2289_v60 }
0x104d   : > { %v2291_v0 = vmul.f32 %v2290_v61, %v2278_v50 }
0x104f   : > { %v2308_v62 = vpack.c.bf16 %v2291_v0, %v2291_v0 }
0x1051   : > { %2946 = vmatmul.mubr.bf16.vlgmr.msra.gmra.mrb[36].mxu0 %v2308_v62 }
0x1124   : > { %v2391_v63 = vpop.f32.mrb[36].mxu0 }
0x1125   : > { %v2397_v2 = vadd.f32 %v2391_v63, %v2215_v38  ;;  %v2947_v4 = vpop.f32.mrb[37].mxu0 }
0x1126   : > { %v2394_v5 = vpop.f32.mrb[38].mxu0 }
0x1127   : > { %v2948_v6 = vpop.f32.mrb[39].mxu0  ;;  %v2405_v7 = vadd.f32 %v2718_v1, %v2397_v2 }
0x1129   : > { %v2408_v8 = vsel %vm916_vm1, %v2405_v7, 0.0 }
0x112a   : > { %2409 = vadd.xlane.f32.xlu0 %v2408_v8 }
0x11b7   : > { %v2410_v9 = vpop.xlane.xlu0 %2409 }
0x11b8   : > { %v2411_v10 = vmul.f32 0.03125, %v2410_v9 }
0x11ba   : > { %v2412_v11 = vsub.f32 %v2405_v7, %v2411_v10 }
0x11bc   : > { %v2413_v12 = vmul.f32 %v2412_v11, %v2412_v11 }
0x11be   : > { %v2414_v13 = vsel %vm916_vm1, %v2413_v12, 0.0 }
0x11bf   : > { %2415 = vadd.xlane.f32.xlu1 %v2414_v13 }
0x124c   : > { %v2416_v14 = vpop.xlane.xlu1 %2415 }
0x124d   : > { %v2417_v15 = vmul.f32 0.03125, %v2416_v14 }
0x124f   : > { %v2418_v16 = vadd.f32 1e-05, %v2417_v15 }
0x1251   : > { %3172 = vrsqrt.f32 %v2418_v16 }
0x125b   : > { %v3173_v17 = vpop.eup %3172 }
0x125c   : > { %v2420_v3 = vmul.f32 %v3173_v17, %v2412_v11 }
0x125e   : > { %v2427_v20 = vmul.f32 %v2719_v18, %v2420_v3 }
0x1260   : > { %v2434_v21 = vadd.f32 %v2720_v19, %v2427_v20 }
0x1262   : > { %2435 = vst.msk [vmem:[%s877_s6] sm:$0xff] %vm916_vm1, %v2434_v21 }
0x1263   : > { %3497 = shalt.err (!%p3494_p5)
}
0x1264   : > { %s3498_s11 = scalar_lea.hbm %s4358_s13, 128  ;;  %s3502_s2 = scalar_lea.hbm %s4511_s12, 256 }
0x1265   : > { %p3499_p7 = scmp.ne.s32.totalorder %s4358_s13, %s3498_s11  ;;  %p3503_p4 = scmp.lt.u32.totalorder %s4358_s13, %s4511_s12 }
0x1266   : > { %p3504_p13 = scmp.lt.u32.totalorder %s3502_s2, %s3498_s11  ;;  %p3506_p3 = scmp.lt.u32.totalorder %s3498_s11, %s4358_s13 }
0x1267   : > { %p3500_p6 = pnand %p3499_p7, %p4512_p2 }
0x1268   : > { %p3505_p1 = por %p3504_p13, %p3503_p4 }
0x1269   : > { %p3501_p9 = pneg %p3500_p6 }
0x126a   : > { %p3507_p0 = por %p3506_p3, %p3505_p1 }
0x126c   : > { %p3508_p10 = pnand %p3507_p0, %p3501_p9 }
0x126e   : > { %3511 = shalt.err (!%p3508_p10)
}
0x126f   : > { %2991 = dma.vmem_to_hbm [thread:$0]  (%p4512_p2), %s4360_s9, 128, %s4358_s13, %s2437_s1  }
0x1270 PF: > { %s2462_s8 = sand.u32 1, %s3558_s4   ;;  %p4513_p11 = scmp.ne.s32.totalorder %s4481_s19, 0 }
0x1271   : > { %p4514_p12 = scmp.ge.s32.totalorder %s3570_s25, 2  ;;  %s2463_s6 = scalar_lea.sflag [#allocation4], %s2462_s8 }
0x1273   : > { %p3029_p8 = pnand %p4514_p12, %p4513_p11 }
0x1275   : > { %3553 = dma.done.wait (!%p3029_p8), %s2463_s6, 128  }
0x1276   : > { %3555 = vsyncadd (!%p3029_p8), %s2463_s6, 4294967168  ;;  %p41_p5 = scmp.ge.s32.totalorder %s3972_s7, 4   ;;  %s4515_s4 = smov %s3562_s30 }
0x1277   : > { %s4516_s30 = smov %s3566_s24  ;;  %s4517_s24 = smov %s3983_s20 }
0x1278   : > { %s4518_s25 = smov %s3972_s7  ;;  %43 = sbr.rel (!%p41_p5) target bundleno = 32 (0x20), region = 203 }
0x127f   :  { %2468 = vsyncpa [#allocation3], 1 }
0x1280   :  { %2470 = vsyncpa [#allocation3 + $0x1], 1 }
0x1281   :  { %2471 = vsyncpa [#allocation6], 1 }
0x1282   :  { %2472 = vsyncpa [#allocation9], 1 }
0x1283   :  { %2473 = vsyncpa [#allocation12], 1 }
0x1284   :  { %2474 = vsyncpa [#allocation15], 1 }
0x1285   :  { %2475 = vsyncpa [#allocation18], 1 }
0x1286   :  { %2476 = vsyncpa [#allocation4], 1 }
0x1287   :  { %2478 = vsyncpa [#allocation4 + $0x1], 1 }

</bundles_post_ra>
